<compile_context>
chip_gen: v7x
topology: tpu7x:2x2x1
jax: 0.10.0
libtpu: 0.0.40
codegen_flags: <defaults>
</compile_context>

<pallas_src>
import functools
import math

import jax
import jax.numpy as jnp
from jax.experimental import pallas as pl
from jax.experimental.pallas import tpu as pltpu


LN_EPS = 1e-5  # nn.LayerNorm default
NEG_INF = -1e9


def _vmem_limit_bytes():
    cap = 64 * 1024 * 1024
    try:
        info = pltpu.get_tpu_info()
        cap = int(getattr(info, "vmem_capacity_bytes", cap))
    except Exception:
        pass
    # ~60% of physical VMEM: ~38 MiB on v7x (64 MiB), ~76 MiB on v5e/v6e (128 MiB)
    return min(max(int(cap * 0.6), 32 * 1024 * 1024), 100 * 1024 * 1024)


VMEM_LIMIT_BYTES = _vmem_limit_bytes()


def _compiler_params(semantics):
    return pltpu.CompilerParams(
        dimension_semantics=semantics,
        vmem_limit_bytes=VMEM_LIMIT_BYTES,
    )


def _bf16(x):
    return x.astype(jnp.bfloat16)


def _row_tile(m, cap=512):
    """Row tile: 8-aligned divisor of m, <= cap, preferring >= 2 grid steps."""
    if m < 16:
        return m
    t = min(cap, (m // 2) // 8 * 8)
    while t >= 8:
        if m % t == 0:
            return t
        t -= 8
    t = min(cap, m)
    while t >= 8:
        if m % t == 0:
            return t
        t -= 8
    return m


def _q_tile(s, cap=256):
    if s <= cap:
        return s
    t = cap - cap % 8
    while t >= 8:
        if s % t == 0:
            return t
        t -= 8
    return s


def _ff_tile(d_ff, cap=2048):
    if d_ff <= cap:
        return d_ff
    t = (cap // 128) * 128
    while t >= 128:
        if d_ff % t == 0:
            return t
        t -= 128
    return d_ff


def _layer_norm(y, g, beta, eps):
    mean = jnp.mean(y, axis=-1, keepdims=True)
    c = y - mean
    var = jnp.mean(c * c, axis=-1, keepdims=True)
    return c * jax.lax.rsqrt(var + eps) * g + beta


def _softmax_rows(s):
    s = s - jnp.max(s, axis=-1, keepdims=True)
    p = jnp.exp(s)
    return p * pl.reciprocal(jnp.sum(p, axis=-1, keepdims=True), approx=True)


# ----------------------------- Pallas kernels ------------------------------ #

def _self_attn_block_kernel(x_ref, mbias_ref, wqkv_ref, bqkv_ref, wo_ref, bo_ref,
                            g_ref, beta_ref, o_ref, *,
                            num_heads, head_dim, q_tile, seq_len, eps):
    """Fused: QKV projection + masked MHA + output projection + residual + LN.

    One (batch, q-tile) per grid step. 1/sqrt(head_dim) is already folded into
    the q columns of wqkv / bqkv by the wrapper. Mask comes in as an additive
    bias (0 / -1e9).
    """
    d_model = num_heads * head_dim
    x_seq = x_ref[0]                                   # (S, D) f32
    if q_tile == seq_len:
        x_q = x_seq
    else:
        row0 = pl.multiple_of(pl.program_id(1) * q_tile, q_tile)
        x_q = jax.lax.dynamic_slice_in_dim(x_seq, row0, q_tile, axis=0)

    wqkv = wqkv_ref[...]                               # (D, 3D) bf16, resident
    b_all = bqkv_ref[...]                              # (1, 3D) f32
    q = (jnp.dot(_bf16(x_q), wqkv[:, :d_model],
                 preferred_element_type=jnp.float32) + b_all[:, :d_model])
    kv = (jnp.dot(_bf16(x_seq), wqkv[:, d_model:],
                  preferred_element_type=jnp.float32) + b_all[:, d_model:])
    k = kv[:, :d_model]
    v = kv[:, d_model:]

    mbias = mbias_ref[...]                             # (tq, S) additive mask bias
    outs = []
    for h in range(num_heads):                         # static loop over heads
        sl = slice(h * head_dim, (h + 1) * head_dim)
        qh, kh, vh = _bf16(q[:, sl]), _bf16(k[:, sl]), _bf16(v[:, sl])
        # contract last dims of both operands: no explicit K transpose
        s = jax.lax.dot_general(qh, kh, (((1,), (1,)), ((), ())),
                                preferred_element_type=jnp.float32)
        p = _softmax_rows(s + mbias)
        outs.append(jnp.dot(_bf16(p), vh, preferred_element_type=jnp.float32))
    attn = jnp.concatenate(outs, axis=-1)              # lane-dense (tq, D)

    proj = (jnp.dot(_bf16(attn), wo_ref[...],
                    preferred_element_type=jnp.float32) + bo_ref[...])
    y = proj + x_q                                     # residual
    o_ref[0] = _layer_norm(y, g_ref[...], beta_ref[...], eps)


def _cross_attn_block_kernel(xq_ref, enc_ref, wq_ref, bq_ref, wkv_ref, bkv_ref,
                             wo_ref, bo_ref, g_ref, beta_ref, o_ref, *,
                             num_heads, head_dim, eps):
    """Fused: q / kv projections + unmasked MHA + output projection + residual + LN."""
    d_model = num_heads * head_dim
    x_q = xq_ref[0]                                    # (tq, D) f32 (also residual)
    enc = enc_ref[0]                                   # (Se, D) f32

    q = (jnp.dot(_bf16(x_q), wq_ref[...],
                 preferred_element_type=jnp.float32) + bq_ref[...])
    kv = (jnp.dot(_bf16(enc), wkv_ref[...],
                  preferred_element_type=jnp.float32) + bkv_ref[...])
    k = kv[:, :d_model]
    v = kv[:, d_model:]

    outs = []
    for h in range(num_heads):
        sl = slice(h * head_dim, (h + 1) * head_dim)
        qh, kh, vh = _bf16(q[:, sl]), _bf16(k[:, sl]), _bf16(v[:, sl])
        s = jax.lax.dot_general(qh, kh, (((1,), (1,)), ((), ())),
                                preferred_element_type=jnp.float32)
        p = _softmax_rows(s)
        outs.append(jnp.dot(_bf16(p), vh, preferred_element_type=jnp.float32))
    attn = jnp.concatenate(outs, axis=-1)

    proj = (jnp.dot(_bf16(attn), wo_ref[...],
                    preferred_element_type=jnp.float32) + bo_ref[...])
    y = proj + x_q
    o_ref[0] = _layer_norm(y, g_ref[...], beta_ref[...], eps)


def _ffn_block_kernel(x_ref, w1_ref, b1_ref, w2_ref, b2_ref, g_ref, beta_ref,
                      o_ref, acc_ref, *, eps):
    """Fused FFN: x@W1+b1 -> ReLU -> @W2 (accumulated over d_ff tiles)
    -> +b2 + residual(x) -> LayerNorm, with a d_ff reduction grid axis."""
    f = pl.program_id(1)

    @pl.when(f == 0)
    def _():
        acc_ref[...] = jnp.zeros_like(acc_ref)

    x = x_ref[...]                                     # (tm, D) f32
    h = (jnp.dot(_bf16(x), w1_ref[...], preferred_element_type=jnp.float32)
         + b1_ref[...])
    h = jnp.maximum(h, 0.0)
    acc_ref[...] += jnp.dot(_bf16(h), w2_ref[...],
                            preferred_element_type=jnp.float32)

    @pl.when(f == pl.num_programs(1) - 1)
    def _():
        y = acc_ref[...] + b2_ref[...] + x             # residual
        o_ref[...] = _layer_norm(y, g_ref[...], beta_ref[...], eps)


# ------------------------------ kernel wrappers ----------------------------- #

def self_attn_block(x, mask_bias, wqkv_bf16, bqkv, wo_bf16, bo, gamma, beta,
                    num_heads, eps=LN_EPS):
    B, S, D = x.shape
    dh = D // num_heads
    tq = _q_tile(S)
    n_qt = S // tq
    kern = functools.partial(_self_attn_block_kernel, num_heads=num_heads,
                             head_dim=dh, q_tile=tq, seq_len=S, eps=eps)
    return pl.pallas_call(
        kern,
        out_shape=jax.ShapeDtypeStruct((B, S, D), jnp.float32),
        grid=(B, n_qt),
        in_specs=[
            pl.BlockSpec((1, S, D), lambda b, qi: (b, 0, 0)),     # full seq (K/V + q slice)
            pl.BlockSpec((tq, S), lambda b, qi: (qi, 0)),         # additive mask bias
            pl.BlockSpec((D, 3 * D), lambda b, qi: (0, 0)),       # bf16, VMEM-resident
            pl.BlockSpec((1, 3 * D), lambda b, qi: (0, 0)),
            pl.BlockSpec((D, D), lambda b, qi: (0, 0)),           # bf16, VMEM-resident
            pl.BlockSpec((1, D), lambda b, qi: (0, 0)),
            pl.BlockSpec((1, D), lambda b, qi: (0, 0)),
            pl.BlockSpec((1, D), lambda b, qi: (0, 0)),
        ],
        out_specs=pl.BlockSpec((1, tq, D), lambda b, qi: (b, qi, 0)),
        compiler_params=_compiler_params(("parallel", "parallel")),
    )(x, mask_bias, wqkv_bf16, bqkv.reshape(1, 3 * D), wo_bf16,
      bo.reshape(1, D), gamma.reshape(1, D), beta.reshape(1, D))


def cross_attn_block(xq, enc, wq_bf16, bq, wkv_bf16, bkv, wo_bf16, bo,
                     gamma, beta, num_heads, eps=LN_EPS):
    B, S, D = xq.shape
    Se = enc.shape[1]
    dh = D // num_heads
    tq = _q_tile(S)
    n_qt = S // tq
    kern = functools.partial(_cross_attn_block_kernel, num_heads=num_heads,
                             head_dim=dh, eps=eps)
    return pl.pallas_call(
        kern,
        out_shape=jax.ShapeDtypeStruct((B, S, D), jnp.float32),
        grid=(B, n_qt),
        in_specs=[
            pl.BlockSpec((1, tq, D), lambda b, qi: (b, qi, 0)),   # decoder q rows / residual
            pl.BlockSpec((1, Se, D), lambda b, qi: (b, 0, 0)),    # encoder output (K/V source)
            pl.BlockSpec((D, D), lambda b, qi: (0, 0)),
            pl.BlockSpec((1, D), lambda b, qi: (0, 0)),
            pl.BlockSpec((D, 2 * D), lambda b, qi: (0, 0)),
            pl.BlockSpec((1, 2 * D), lambda b, qi: (0, 0)),
            pl.BlockSpec((D, D), lambda b, qi: (0, 0)),
            pl.BlockSpec((1, D), lambda b, qi: (0, 0)),
            pl.BlockSpec((1, D), lambda b, qi: (0, 0)),
            pl.BlockSpec((1, D), lambda b, qi: (0, 0)),
        ],
        out_specs=pl.BlockSpec((1, tq, D), lambda b, qi: (b, qi, 0)),
        compiler_params=_compiler_params(("parallel", "parallel")),
    )(xq, enc, wq_bf16, bq.reshape(1, D), wkv_bf16, bkv.reshape(1, 2 * D),
      wo_bf16, bo.reshape(1, D), gamma.reshape(1, D), beta.reshape(1, D))


def ffn_block(x2, w1_bf16, b1, w2_bf16, b2, gamma, beta, eps=LN_EPS):
    M, D = x2.shape
    d_ff = w1_bf16.shape[1]
    tm = _row_tile(M)
    tf = _ff_tile(d_ff)
    kern = functools.partial(_ffn_block_kernel, eps=eps)
    return pl.pallas_call(
        kern,
        out_shape=jax.ShapeDtypeStruct((M, D), jnp.float32),
        grid=(M // tm, d_ff // tf),
        in_specs=[
            pl.BlockSpec((tm, D), lambda i, f: (i, 0)),
            pl.BlockSpec((D, tf), lambda i, f: (0, f)),           # bf16 W1 column tile
            pl.BlockSpec((1, tf), lambda i, f: (0, f)),
            pl.BlockSpec((tf, D), lambda i, f: (f, 0)),           # bf16 W2 row tile
            pl.BlockSpec((1, D), lambda i, f: (0, 0)),
            pl.BlockSpec((1, D), lambda i, f: (0, 0)),
            pl.BlockSpec((1, D), lambda i, f: (0, 0)),
        ],
        out_specs=pl.BlockSpec((tm, D), lambda i, f: (i, 0)),
        scratch_shapes=[pltpu.VMEM((tm, D), jnp.float32)],
        compiler_params=_compiler_params(("parallel", "arbitrary")),
    )(x2, w1_bf16, b1.reshape(1, d_ff), w2_bf16, b2.reshape(1, D),
      gamma.reshape(1, D), beta.reshape(1, D))


# ------------------------------ module forward ------------------------------ #

def decoder_layer(x, encoder_output, mask, params, num_heads):
    B, S, D = x.shape
    dh = D // num_heads
    scale = jnp.float32(1.0 / math.sqrt(dh))

    # additive mask bias (0 where attend, -1e9 where masked); broadcast over heads
    mask_bias = jnp.where(mask != 0, 0.0, NEG_INF).astype(jnp.float32)

    # --- masked self-attention + output proj + residual + LayerNorm (1 kernel)
    pa = params["masked_attn"]
    # fold 1/sqrt(head_dim) into the q columns of the fused QKV projection
    wqkv = _bf16(pa["wqkv"].at[:, :D].multiply(scale))
    bqkv = pa["bqkv"].at[:D].multiply(scale)
    h1 = self_attn_block(x, mask_bias, wqkv, bqkv, _bf16(pa["wo"]), pa["bo"],
                         params["ln1"]["gamma"], params["ln1"]["beta"], num_heads)

    # --- encoder-decoder (cross) attention + output proj + residual + LN (1 kernel)
    pc = params["encoder_attn"]
    h2 = cross_attn_block(h1, encoder_output,
                          _bf16(pc["wq"] * scale), pc["bq"] * scale,
                          _bf16(pc["wkv"]), pc["bkv"],
                          _bf16(pc["wo"]), pc["bo"],
                          params["ln2"]["gamma"], params["ln2"]["beta"], num_heads)

    # --- position-wise feed forward + residual + LayerNorm (1 kernel)
    pf = params["ffn"]
    h3 = ffn_block(h2.reshape(B * S, D),
                   _bf16(pf["w1"]), pf["b1"], _bf16(pf["w2"]), pf["b2"],
                   params["ln3"]["gamma"], params["ln3"]["beta"])
    return h3.reshape(B, S, D)


# ------------------------------ parameter init ------------------------------ #

def _init_linear(key, din, dout):
    k1, k2 = jax.random.split(key)
    limit = 1.0 / math.sqrt(din)
    w = jax.random.uniform(k1, (din, dout), jnp.float32, -limit, limit)
    b = jax.random.uniform(k2, (dout,), jnp.float32, -limit, limit)
    return w, b


def init_decoder_params(key, d_model, d_ff):
    ks = jax.random.split(key, 4)

    def mha_params(k, fuse_qkv):
        kq, kk, kv, ko = jax.random.split(k, 4)
        wq, bq = _init_linear(kq, d_model, d_model)
        wk, bk = _init_linear(kk, d_model, d_model)
        wv, bv = _init_linear(kv, d_model, d_model)
        wo, bo = _init_linear(ko, d_model, d_model)
        if fuse_qkv:   # self-attention: q/k/v share the same input -> fused (D, 3D)
            return dict(wqkv=jnp.concatenate([wq, wk, wv], axis=1),
                        bqkv=jnp.concatenate([bq, bk, bv]),
                        wo=wo, bo=bo)
        # cross-attention: q from decoder stream, k/v from encoder -> fused (D, 2D)
        return dict(wq=wq, bq=bq,
                    wkv=jnp.concatenate([wk, wv], axis=1),
                    bkv=jnp.concatenate([bk, bv]),
                    wo=wo, bo=bo)

    def ln_params():
        return dict(gamma=jnp.ones((d_model,), jnp.float32),
                    beta=jnp.zeros((d_model,), jnp.float32))

    w1, b1 = _init_linear(ks[2], d_model, d_ff)
    w2, b2 = _init_linear(ks[3], d_ff, d_model)

    return dict(
        masked_attn=mha_params(ks[0], True),
        encoder_attn=mha_params(ks[1], False),
        ln1=ln_params(), ln2=ln_params(), ln3=ln_params(),
        ffn=dict(w1=w1, b1=b1, w2=w2, b2=b2),
    )


# ----------------------------------- main ----------------------------------- #

if __name__ == "__main__":
    B, S_dec, S_enc = 2, 8, 8
    d_model, num_heads, d_ff = 32, 4, 64

    root = jax.random.PRNGKey(0)
    k_x, k_enc, k_p = jax.random.split(root, 3)

    x = jax.random.normal(k_x, (B, S_dec, d_model), jnp.float32)
    encoder_output = jax.random.normal(k_enc, (B, S_enc, d_model), jnp.float32)
    # causal mask: 1 where attention is allowed, 0 where it is masked out
    mask = jnp.tril(jnp.ones((S_dec, S_dec), jnp.float32))

    params = init_decoder_params(k_p, d_model, d_ff)

    fwd = jax.jit(lambda x_, enc_, m_, p_: decoder_layer(x_, enc_, m_, p_, num_heads))
    out = fwd(x, encoder_output, mask, params)
    out = jax.block_until_ready(out)

    assert out.shape == (B, S_dec, d_model)
    assert bool(jnp.all(jnp.isfinite(out)))
    print("KERNEL_OK")
</pallas_src>

<mosaic_0001>
module attributes {stable_mosaic.version = 11 : i64} {
  func.func @_self_attn_block_kernel(%arg0: i32, %arg1: i32, %arg2: memref<1x8x32xf32, #tpu.memory_space<vmem>>, %arg3: memref<8x8xf32, #tpu.memory_space<vmem>>, %arg4: memref<32x96xbf16, #tpu.memory_space<vmem>>, %arg5: memref<1x96xf32, #tpu.memory_space<vmem>>, %arg6: memref<32x32xbf16, #tpu.memory_space<vmem>>, %arg7: memref<1x32xf32, #tpu.memory_space<vmem>>, %arg8: memref<1x32xf32, #tpu.memory_space<vmem>>, %arg9: memref<1x32xf32, #tpu.memory_space<vmem>>, %arg10: memref<1x8x32xf32, #tpu.memory_space<vmem>>) attributes {dimension_semantics = [#tpu.dimension_semantics<parallel>, #tpu.dimension_semantics<parallel>], iteration_bounds = array<i64: 2, 1>, scalar_prefetch = 0 : i64, scratch_operands = 0 : i64, tpu.core_type = #tpu.core_type<tc>, window_params = [{transform_indices = @transform_0, window_bounds = array<i64: 1, 8, 32>}, {transform_indices = @transform_1, window_bounds = array<i64: 8, 8>}, {pipeline_mode = #tpu.pipeline_mode<synchronous>, transform_indices = @transform_2, window_bounds = array<i64: 32, 96>}, {pipeline_mode = #tpu.pipeline_mode<synchronous>, transform_indices = @transform_3, window_bounds = array<i64: 1, 96>}, {pipeline_mode = #tpu.pipeline_mode<synchronous>, transform_indices = @transform_4, window_bounds = array<i64: 32, 32>}, {pipeline_mode = #tpu.pipeline_mode<synchronous>, transform_indices = @transform_5, window_bounds = array<i64: 1, 32>}, {pipeline_mode = #tpu.pipeline_mode<synchronous>, transform_indices = @transform_6, window_bounds = array<i64: 1, 32>}, {pipeline_mode = #tpu.pipeline_mode<synchronous>, transform_indices = @transform_7, window_bounds = array<i64: 1, 32>}, {transform_indices = @transform_8, window_bounds = array<i64: 1, 8, 32>}]} {
    %c0 = arith.constant 0 : index
    %c0_0 = arith.constant 0 : index
    %c0_1 = arith.constant 0 : index
    %0 = vector.load %arg2[%c0, %c0_0, %c0_1] : memref<1x8x32xf32, #tpu.memory_space<vmem>>, vector<1x8x32xf32>
    %1 = vector.shape_cast %0 : vector<1x8x32xf32> to vector<8x32xf32>
    %c0_2 = arith.constant 0 : index
    %c0_3 = arith.constant 0 : index
    %2 = vector.load %arg4[%c0_2, %c0_3] : memref<32x96xbf16, #tpu.memory_space<vmem>>, vector<32x96xbf16>
    %c0_4 = arith.constant 0 : index
    %c0_5 = arith.constant 0 : index
    %3 = vector.load %arg5[%c0_4, %c0_5] : memref<1x96xf32, #tpu.memory_space<vmem>>, vector<1x96xf32>
    %4 = arith.truncf %1 : vector<8x32xf32> to vector<8x32xbf16>
    %5 = vector.extract_strided_slice %2 {offsets = [0, 0], sizes = [32, 32], strides = [1, 1]} : vector<32x96xbf16> to vector<32x32xbf16>
    %cst = arith.constant dense<0.000000e+00> : vector<8x32xf32>
    %6 = tpu.matmul %4, %5, %cst {dimension_numbers = #tpu.dot_dimension_numbers<[1], [0], [0], [1], [0, 0, 1, 1], [], []>} : vector<8x32xbf16>, vector<32x32xbf16>, vector<8x32xf32> -> vector<8x32xf32>
    %7 = vector.extract_strided_slice %3 {offsets = [0, 0], sizes = [1, 32], strides = [1, 1]} : vector<1x96xf32> to vector<1x32xf32>
    %8 = vector.broadcast %7 : vector<1x32xf32> to vector<8x32xf32>
    %9 = arith.addf %6, %8 : vector<8x32xf32>
    %10 = arith.truncf %1 : vector<8x32xf32> to vector<8x32xbf16>
    %11 = vector.extract_strided_slice %2 {offsets = [0, 32], sizes = [32, 64], strides = [1, 1]} : vector<32x96xbf16> to vector<32x64xbf16>
    %cst_6 = arith.constant dense<0.000000e+00> : vector<8x64xf32>
    %12 = tpu.matmul %10, %11, %cst_6 {dimension_numbers = #tpu.dot_dimension_numbers<[1], [0], [0], [1], [0, 0, 1, 1], [], []>} : vector<8x32xbf16>, vector<32x64xbf16>, vector<8x64xf32> -> vector<8x64xf32>
    %13 = vector.extract_strided_slice %3 {offsets = [0, 32], sizes = [1, 64], strides = [1, 1]} : vector<1x96xf32> to vector<1x64xf32>
    %14 = vector.broadcast %13 : vector<1x64xf32> to vector<8x64xf32>
    %15 = arith.addf %12, %14 : vector<8x64xf32>
    %16 = vector.extract_strided_slice %15 {offsets = [0, 0], sizes = [8, 32], strides = [1, 1]} : vector<8x64xf32> to vector<8x32xf32>
    %17 = vector.extract_strided_slice %15 {offsets = [0, 32], sizes = [8, 32], strides = [1, 1]} : vector<8x64xf32> to vector<8x32xf32>
    %c0_7 = arith.constant 0 : index
    %c0_8 = arith.constant 0 : index
    %18 = vector.load %arg3[%c0_7, %c0_8] : memref<8x8xf32, #tpu.memory_space<vmem>>, vector<8x8xf32>
    %19 = vector.extract_strided_slice %9 {offsets = [0, 0], sizes = [8, 8], strides = [1, 1]} : vector<8x32xf32> to vector<8x8xf32>
    %20 = arith.truncf %19 : vector<8x8xf32> to vector<8x8xbf16>
    %21 = vector.extract_strided_slice %16 {offsets = [0, 0], sizes = [8, 8], strides = [1, 1]} : vector<8x32xf32> to vector<8x8xf32>
    %22 = arith.truncf %21 : vector<8x8xf32> to vector<8x8xbf16>
    %23 = vector.extract_strided_slice %17 {offsets = [0, 0], sizes = [8, 8], strides = [1, 1]} : vector<8x32xf32> to vector<8x8xf32>
    %24 = arith.truncf %23 : vector<8x8xf32> to vector<8x8xbf16>
    %cst_9 = arith.constant dense<0.000000e+00> : vector<8x8xf32>
    %25 = tpu.matmul %20, %22, %cst_9 {dimension_numbers = #tpu.dot_dimension_numbers<[1], [1], [0], [0], [0, 0, 1, 0], [], []>} : vector<8x8xbf16>, vector<8x8xbf16>, vector<8x8xf32> -> vector<8x8xf32>
    %26 = arith.addf %25, %18 : vector<8x8xf32>
    %cst_10 = arith.constant dense<0xFF800000> : vector<8xf32>
    %27 = vector.multi_reduction <maximumf>, %26, %cst_10 [1] : vector<8x8xf32> to vector<8xf32>
    %28 = vector.shape_cast %27 : vector<8xf32> to vector<8x1xf32>
    %29 = vector.broadcast %28 : vector<8x1xf32> to vector<8x8xf32>
    %30 = arith.subf %26, %29 : vector<8x8xf32>
    %31 = math.exp %30 : vector<8x8xf32>
    %cst_11 = arith.constant dense<0.000000e+00> : vector<8xf32>
    %32 = vector.multi_reduction <add>, %31, %cst_11 [1] : vector<8x8xf32> to vector<8xf32>
    %33 = vector.shape_cast %32 : vector<8xf32> to vector<8x1xf32>
    %34 = tpu.reciprocal %33 {approx = true} : vector<8x1xf32> -> vector<8x1xf32>
    %35 = vector.broadcast %34 : vector<8x1xf32> to vector<8x8xf32>
    %36 = arith.mulf %31, %35 : vector<8x8xf32>
    %37 = arith.truncf %36 : vector<8x8xf32> to vector<8x8xbf16>
    %cst_12 = arith.constant dense<0.000000e+00> : vector<8x8xf32>
    %38 = tpu.matmul %37, %24, %cst_12 {dimension_numbers = #tpu.dot_dimension_numbers<[1], [0], [0], [1], [0, 0, 1, 1], [], []>} : vector<8x8xbf16>, vector<8x8xbf16>, vector<8x8xf32> -> vector<8x8xf32>
    %39 = vector.extract_strided_slice %9 {offsets = [0, 8], sizes = [8, 8], strides = [1, 1]} : vector<8x32xf32> to vector<8x8xf32>
    %40 = arith.truncf %39 : vector<8x8xf32> to vector<8x8xbf16>
    %41 = vector.extract_strided_slice %16 {offsets = [0, 8], sizes = [8, 8], strides = [1, 1]} : vector<8x32xf32> to vector<8x8xf32>
    %42 = arith.truncf %41 : vector<8x8xf32> to vector<8x8xbf16>
    %43 = vector.extract_strided_slice %17 {offsets = [0, 8], sizes = [8, 8], strides = [1, 1]} : vector<8x32xf32> to vector<8x8xf32>
    %44 = arith.truncf %43 : vector<8x8xf32> to vector<8x8xbf16>
    %cst_13 = arith.constant dense<0.000000e+00> : vector<8x8xf32>
    %45 = tpu.matmul %40, %42, %cst_13 {dimension_numbers = #tpu.dot_dimension_numbers<[1], [1], [0], [0], [0, 0, 1, 0], [], []>} : vector<8x8xbf16>, vector<8x8xbf16>, vector<8x8xf32> -> vector<8x8xf32>
    %46 = arith.addf %45, %18 : vector<8x8xf32>
    %cst_14 = arith.constant dense<0xFF800000> : vector<8xf32>
    %47 = vector.multi_reduction <maximumf>, %46, %cst_14 [1] : vector<8x8xf32> to vector<8xf32>
    %48 = vector.shape_cast %47 : vector<8xf32> to vector<8x1xf32>
    %49 = vector.broadcast %48 : vector<8x1xf32> to vector<8x8xf32>
    %50 = arith.subf %46, %49 : vector<8x8xf32>
    %51 = math.exp %50 : vector<8x8xf32>
    %cst_15 = arith.constant dense<0.000000e+00> : vector<8xf32>
    %52 = vector.multi_reduction <add>, %51, %cst_15 [1] : vector<8x8xf32> to vector<8xf32>
    %53 = vector.shape_cast %52 : vector<8xf32> to vector<8x1xf32>
    %54 = tpu.reciprocal %53 {approx = true} : vector<8x1xf32> -> vector<8x1xf32>
    %55 = vector.broadcast %54 : vector<8x1xf32> to vector<8x8xf32>
    %56 = arith.mulf %51, %55 : vector<8x8xf32>
    %57 = arith.truncf %56 : vector<8x8xf32> to vector<8x8xbf16>
    %cst_16 = arith.constant dense<0.000000e+00> : vector<8x8xf32>
    %58 = tpu.matmul %57, %44, %cst_16 {dimension_numbers = #tpu.dot_dimension_numbers<[1], [0], [0], [1], [0, 0, 1, 1], [], []>} : vector<8x8xbf16>, vector<8x8xbf16>, vector<8x8xf32> -> vector<8x8xf32>
    %59 = vector.extract_strided_slice %9 {offsets = [0, 16], sizes = [8, 8], strides = [1, 1]} : vector<8x32xf32> to vector<8x8xf32>
    %60 = arith.truncf %59 : vector<8x8xf32> to vector<8x8xbf16>
    %61 = vector.extract_strided_slice %16 {offsets = [0, 16], sizes = [8, 8], strides = [1, 1]} : vector<8x32xf32> to vector<8x8xf32>
    %62 = arith.truncf %61 : vector<8x8xf32> to vector<8x8xbf16>
    %63 = vector.extract_strided_slice %17 {offsets = [0, 16], sizes = [8, 8], strides = [1, 1]} : vector<8x32xf32> to vector<8x8xf32>
    %64 = arith.truncf %63 : vector<8x8xf32> to vector<8x8xbf16>
    %cst_17 = arith.constant dense<0.000000e+00> : vector<8x8xf32>
    %65 = tpu.matmul %60, %62, %cst_17 {dimension_numbers = #tpu.dot_dimension_numbers<[1], [1], [0], [0], [0, 0, 1, 0], [], []>} : vector<8x8xbf16>, vector<8x8xbf16>, vector<8x8xf32> -> vector<8x8xf32>
    %66 = arith.addf %65, %18 : vector<8x8xf32>
    %cst_18 = arith.constant dense<0xFF800000> : vector<8xf32>
    %67 = vector.multi_reduction <maximumf>, %66, %cst_18 [1] : vector<8x8xf32> to vector<8xf32>
    %68 = vector.shape_cast %67 : vector<8xf32> to vector<8x1xf32>
    %69 = vector.broadcast %68 : vector<8x1xf32> to vector<8x8xf32>
    %70 = arith.subf %66, %69 : vector<8x8xf32>
    %71 = math.exp %70 : vector<8x8xf32>
    %cst_19 = arith.constant dense<0.000000e+00> : vector<8xf32>
    %72 = vector.multi_reduction <add>, %71, %cst_19 [1] : vector<8x8xf32> to vector<8xf32>
    %73 = vector.shape_cast %72 : vector<8xf32> to vector<8x1xf32>
    %74 = tpu.reciprocal %73 {approx = true} : vector<8x1xf32> -> vector<8x1xf32>
    %75 = vector.broadcast %74 : vector<8x1xf32> to vector<8x8xf32>
    %76 = arith.mulf %71, %75 : vector<8x8xf32>
    %77 = arith.truncf %76 : vector<8x8xf32> to vector<8x8xbf16>
    %cst_20 = arith.constant dense<0.000000e+00> : vector<8x8xf32>
    %78 = tpu.matmul %77, %64, %cst_20 {dimension_numbers = #tpu.dot_dimension_numbers<[1], [0], [0], [1], [0, 0, 1, 1], [], []>} : vector<8x8xbf16>, vector<8x8xbf16>, vector<8x8xf32> -> vector<8x8xf32>
    %79 = vector.extract_strided_slice %9 {offsets = [0, 24], sizes = [8, 8], strides = [1, 1]} : vector<8x32xf32> to vector<8x8xf32>
    %80 = arith.truncf %79 : vector<8x8xf32> to vector<8x8xbf16>
    %81 = vector.extract_strided_slice %16 {offsets = [0, 24], sizes = [8, 8], strides = [1, 1]} : vector<8x32xf32> to vector<8x8xf32>
    %82 = arith.truncf %81 : vector<8x8xf32> to vector<8x8xbf16>
    %83 = vector.extract_strided_slice %17 {offsets = [0, 24], sizes = [8, 8], strides = [1, 1]} : vector<8x32xf32> to vector<8x8xf32>
    %84 = arith.truncf %83 : vector<8x8xf32> to vector<8x8xbf16>
    %cst_21 = arith.constant dense<0.000000e+00> : vector<8x8xf32>
    %85 = tpu.matmul %80, %82, %cst_21 {dimension_numbers = #tpu.dot_dimension_numbers<[1], [1], [0], [0], [0, 0, 1, 0], [], []>} : vector<8x8xbf16>, vector<8x8xbf16>, vector<8x8xf32> -> vector<8x8xf32>
    %86 = arith.addf %85, %18 : vector<8x8xf32>
    %cst_22 = arith.constant dense<0xFF800000> : vector<8xf32>
    %87 = vector.multi_reduction <maximumf>, %86, %cst_22 [1] : vector<8x8xf32> to vector<8xf32>
    %88 = vector.shape_cast %87 : vector<8xf32> to vector<8x1xf32>
    %89 = vector.broadcast %88 : vector<8x1xf32> to vector<8x8xf32>
    %90 = arith.subf %86, %89 : vector<8x8xf32>
    %91 = math.exp %90 : vector<8x8xf32>
    %cst_23 = arith.constant dense<0.000000e+00> : vector<8xf32>
    %92 = vector.multi_reduction <add>, %91, %cst_23 [1] : vector<8x8xf32> to vector<8xf32>
    %93 = vector.shape_cast %92 : vector<8xf32> to vector<8x1xf32>
    %94 = tpu.reciprocal %93 {approx = true} : vector<8x1xf32> -> vector<8x1xf32>
    %95 = vector.broadcast %94 : vector<8x1xf32> to vector<8x8xf32>
    %96 = arith.mulf %91, %95 : vector<8x8xf32>
    %97 = arith.truncf %96 : vector<8x8xf32> to vector<8x8xbf16>
    %cst_24 = arith.constant dense<0.000000e+00> : vector<8x8xf32>
    %98 = tpu.matmul %97, %84, %cst_24 {dimension_numbers = #tpu.dot_dimension_numbers<[1], [0], [0], [1], [0, 0, 1, 1], [], []>} : vector<8x8xbf16>, vector<8x8xbf16>, vector<8x8xf32> -> vector<8x8xf32>
    %99 = tpu.concatenate %38, %58, %78, %98 in 1 : vector<8x8xf32>, vector<8x8xf32>, vector<8x8xf32>, vector<8x8xf32> -> vector<8x32xf32>
    %100 = arith.truncf %99 : vector<8x32xf32> to vector<8x32xbf16>
    %c0_25 = arith.constant 0 : index
    %c0_26 = arith.constant 0 : index
    %101 = vector.load %arg6[%c0_25, %c0_26] : memref<32x32xbf16, #tpu.memory_space<vmem>>, vector<32x32xbf16>
    %cst_27 = arith.constant dense<0.000000e+00> : vector<8x32xf32>
    %102 = tpu.matmul %100, %101, %cst_27 {dimension_numbers = #tpu.dot_dimension_numbers<[1], [0], [0], [1], [0, 0, 1, 1], [], []>} : vector<8x32xbf16>, vector<32x32xbf16>, vector<8x32xf32> -> vector<8x32xf32>
    %c0_28 = arith.constant 0 : index
    %c0_29 = arith.constant 0 : index
    %103 = vector.load %arg7[%c0_28, %c0_29] : memref<1x32xf32, #tpu.memory_space<vmem>>, vector<1x32xf32>
    %104 = vector.broadcast %103 : vector<1x32xf32> to vector<8x32xf32>
    %105 = arith.addf %102, %104 : vector<8x32xf32>
    %106 = arith.addf %105, %1 : vector<8x32xf32>
    %c0_30 = arith.constant 0 : index
    %c0_31 = arith.constant 0 : index
    %107 = vector.load %arg8[%c0_30, %c0_31] : memref<1x32xf32, #tpu.memory_space<vmem>>, vector<1x32xf32>
    %c0_32 = arith.constant 0 : index
    %c0_33 = arith.constant 0 : index
    %108 = vector.load %arg9[%c0_32, %c0_33] : memref<1x32xf32, #tpu.memory_space<vmem>>, vector<1x32xf32>
    %cst_34 = arith.constant dense<0.000000e+00> : vector<8xf32>
    %109 = vector.multi_reduction <add>, %106, %cst_34 [1] : vector<8x32xf32> to vector<8xf32>
    %110 = vector.shape_cast %109 : vector<8xf32> to vector<8x1xf32>
    %cst_35 = arith.constant 3.200000e+01 : f32
    %111 = vector.broadcast %cst_35 : f32 to vector<8x1xf32>
    %112 = arith.divf %110, %111 : vector<8x1xf32>
    %113 = vector.broadcast %112 : vector<8x1xf32> to vector<8x32xf32>
    %114 = arith.subf %106, %113 : vector<8x32xf32>
    %115 = arith.mulf %114, %114 : vector<8x32xf32>
    %cst_36 = arith.constant dense<0.000000e+00> : vector<8xf32>
    %116 = vector.multi_reduction <add>, %115, %cst_36 [1] : vector<8x32xf32> to vector<8xf32>
    %117 = vector.shape_cast %116 : vector<8xf32> to vector<8x1xf32>
    %cst_37 = arith.constant 3.200000e+01 : f32
    %118 = vector.broadcast %cst_37 : f32 to vector<8x1xf32>
    %119 = arith.divf %117, %118 : vector<8x1xf32>
    %cst_38 = arith.constant 9.99999974E-6 : f32
    %120 = vector.broadcast %cst_38 : f32 to vector<8x1xf32>
    %121 = arith.addf %119, %120 : vector<8x1xf32>
    %122 = math.rsqrt %121 : vector<8x1xf32>
    %123 = vector.broadcast %122 : vector<8x1xf32> to vector<8x32xf32>
    %124 = arith.mulf %114, %123 : vector<8x32xf32>
    %125 = vector.broadcast %107 : vector<1x32xf32> to vector<8x32xf32>
    %126 = arith.mulf %124, %125 : vector<8x32xf32>
    %127 = vector.broadcast %108 : vector<1x32xf32> to vector<8x32xf32>
    %128 = arith.addf %126, %127 : vector<8x32xf32>
    %c0_39 = arith.constant 0 : index
    %c0_40 = arith.constant 0 : index
    %c0_41 = arith.constant 0 : index
    %129 = vector.load %arg10[%c0_39, %c0_40, %c0_41] : memref<1x8x32xf32, #tpu.memory_space<vmem>>, vector<1x8x32xf32>
    %130 = vector.shape_cast %129 : vector<1x8x32xf32> to vector<8x32xf32>
    %131 = vector.shape_cast %128 : vector<8x32xf32> to vector<1x8x32xf32>
    tpu.vector_store %arg10[%c0_39, %c0_40, %c0_41], %131 {strides = array<i32>} : memref<1x8x32xf32, #tpu.memory_space<vmem>>, vector<1x8x32xf32>,
    return
  }
  func.func @transform_0(%arg0: i32, %arg1: i32) -> (i32, i32, i32) {
    %c0_i32 = arith.constant 0 : i32
    %c0_i32_0 = arith.constant 0 : i32
    %c0_i32_1 = arith.constant 0 : i32
    return %arg0, %c0_i32, %c0_i32_0 : i32, i32, i32
  }
  func.func @transform_1(%arg0: i32, %arg1: i32) -> (i32, i32) {
    %c0_i32 = arith.constant 0 : i32
    %c0_i32_0 = arith.constant 0 : i32
    return %arg1, %c0_i32 : i32, i32
  }
  func.func @transform_2(%arg0: i32, %arg1: i32) -> (i32, i32) {
    %c0_i32 = arith.constant 0 : i32
    %c0_i32_0 = arith.constant 0 : i32
    %c0_i32_1 = arith.constant 0 : i32
    return %c0_i32, %c0_i32_0 : i32, i32
  }
  func.func @transform_3(%arg0: i32, %arg1: i32) -> (i32, i32) {
    %c0_i32 = arith.constant 0 : i32
    %c0_i32_0 = arith.constant 0 : i32
    %c0_i32_1 = arith.constant 0 : i32
    return %c0_i32, %c0_i32_0 : i32, i32
  }
  func.func @transform_4(%arg0: i32, %arg1: i32) -> (i32, i32) {
    %c0_i32 = arith.constant 0 : i32
    %c0_i32_0 = arith.constant 0 : i32
    %c0_i32_1 = arith.constant 0 : i32
    return %c0_i32, %c0_i32_0 : i32, i32
  }
  func.func @transform_5(%arg0: i32, %arg1: i32) -> (i32, i32) {
    %c0_i32 = arith.constant 0 : i32
    %c0_i32_0 = arith.constant 0 : i32
    %c0_i32_1 = arith.constant 0 : i32
    return %c0_i32, %c0_i32_0 : i32, i32
  }
  func.func @transform_6(%arg0: i32, %arg1: i32) -> (i32, i32) {
    %c0_i32 = arith.constant 0 : i32
    %c0_i32_0 = arith.constant 0 : i32
    %c0_i32_1 = arith.constant 0 : i32
    return %c0_i32, %c0_i32_0 : i32, i32
  }
  func.func @transform_7(%arg0: i32, %arg1: i32) -> (i32, i32) {
    %c0_i32 = arith.constant 0 : i32
    %c0_i32_0 = arith.constant 0 : i32
    %c0_i32_1 = arith.constant 0 : i32
    return %c0_i32, %c0_i32_0 : i32, i32
  }
  func.func @transform_8(%arg0: i32, %arg1: i32) -> (i32, i32, i32) {
    %c0_i32 = arith.constant 0 : i32
    %c0_i32_0 = arith.constant 0 : i32
    return %arg0, %arg1, %c0_i32 : i32, i32, i32
  }
}

module attributes {stable_mosaic.version = 11 : i64} {
  func.func @_cross_attn_block_kernel(%arg0: i32, %arg1: i32, %arg2: memref<1x8x32xf32, #tpu.memory_space<vmem>>, %arg3: memref<1x8x32xf32, #tpu.memory_space<vmem>>, %arg4: memref<32x32xbf16, #tpu.memory_space<vmem>>, %arg5: memref<1x32xf32, #tpu.memory_space<vmem>>, %arg6: memref<32x64xbf16, #tpu.memory_space<vmem>>, %arg7: memref<1x64xf32, #tpu.memory_space<vmem>>, %arg8: memref<32x32xbf16, #tpu.memory_space<vmem>>, %arg9: memref<1x32xf32, #tpu.memory_space<vmem>>, %arg10: memref<1x32xf32, #tpu.memory_space<vmem>>, %arg11: memref<1x32xf32, #tpu.memory_space<vmem>>, %arg12: memref<1x8x32xf32, #tpu.memory_space<vmem>>) attributes {dimension_semantics = [#tpu.dimension_semantics<parallel>, #tpu.dimension_semantics<parallel>], iteration_bounds = array<i64: 2, 1>, scalar_prefetch = 0 : i64, scratch_operands = 0 : i64, tpu.core_type = #tpu.core_type<tc>, window_params = [{transform_indices = @transform_0, window_bounds = array<i64: 1, 8, 32>}, {transform_indices = @transform_1, window_bounds = array<i64: 1, 8, 32>}, {pipeline_mode = #tpu.pipeline_mode<synchronous>, transform_indices = @transform_2, window_bounds = array<i64: 32, 32>}, {pipeline_mode = #tpu.pipeline_mode<synchronous>, transform_indices = @transform_3, window_bounds = array<i64: 1, 32>}, {pipeline_mode = #tpu.pipeline_mode<synchronous>, transform_indices = @transform_4, window_bounds = array<i64: 32, 64>}, {pipeline_mode = #tpu.pipeline_mode<synchronous>, transform_indices = @transform_5, window_bounds = array<i64: 1, 64>}, {pipeline_mode = #tpu.pipeline_mode<synchronous>, transform_indices = @transform_6, window_bounds = array<i64: 32, 32>}, {pipeline_mode = #tpu.pipeline_mode<synchronous>, transform_indices = @transform_7, window_bounds = array<i64: 1, 32>}, {pipeline_mode = #tpu.pipeline_mode<synchronous>, transform_indices = @transform_8, window_bounds = array<i64: 1, 32>}, {pipeline_mode = #tpu.pipeline_mode<synchronous>, transform_indices = @transform_9, window_bounds = array<i64: 1, 32>}, {transform_indices = @transform_10, window_bounds = array<i64: 1, 8, 32>}]} {
    %c0 = arith.constant 0 : index
    %c0_0 = arith.constant 0 : index
    %c0_1 = arith.constant 0 : index
    %0 = vector.load %arg2[%c0, %c0_0, %c0_1] : memref<1x8x32xf32, #tpu.memory_space<vmem>>, vector<1x8x32xf32>
    %1 = vector.shape_cast %0 : vector<1x8x32xf32> to vector<8x32xf32>
    %c0_2 = arith.constant 0 : index
    %c0_3 = arith.constant 0 : index
    %c0_4 = arith.constant 0 : index
    %2 = vector.load %arg3[%c0_2, %c0_3, %c0_4] : memref<1x8x32xf32, #tpu.memory_space<vmem>>, vector<1x8x32xf32>
    %3 = vector.shape_cast %2 : vector<1x8x32xf32> to vector<8x32xf32>
    %4 = arith.truncf %1 : vector<8x32xf32> to vector<8x32xbf16>
    %c0_5 = arith.constant 0 : index
    %c0_6 = arith.constant 0 : index
    %5 = vector.load %arg4[%c0_5, %c0_6] : memref<32x32xbf16, #tpu.memory_space<vmem>>, vector<32x32xbf16>
    %cst = arith.constant dense<0.000000e+00> : vector<8x32xf32>
    %6 = tpu.matmul %4, %5, %cst {dimension_numbers = #tpu.dot_dimension_numbers<[1], [0], [0], [1], [0, 0, 1, 1], [], []>} : vector<8x32xbf16>, vector<32x32xbf16>, vector<8x32xf32> -> vector<8x32xf32>
    %c0_7 = arith.constant 0 : index
    %c0_8 = arith.constant 0 : index
    %7 = vector.load %arg5[%c0_7, %c0_8] : memref<1x32xf32, #tpu.memory_space<vmem>>, vector<1x32xf32>
    %8 = vector.broadcast %7 : vector<1x32xf32> to vector<8x32xf32>
    %9 = arith.addf %6, %8 : vector<8x32xf32>
    %10 = arith.truncf %3 : vector<8x32xf32> to vector<8x32xbf16>
    %c0_9 = arith.constant 0 : index
    %c0_10 = arith.constant 0 : index
    %11 = vector.load %arg6[%c0_9, %c0_10] : memref<32x64xbf16, #tpu.memory_space<vmem>>, vector<32x64xbf16>
    %cst_11 = arith.constant dense<0.000000e+00> : vector<8x64xf32>
    %12 = tpu.matmul %10, %11, %cst_11 {dimension_numbers = #tpu.dot_dimension_numbers<[1], [0], [0], [1], [0, 0, 1, 1], [], []>} : vector<8x32xbf16>, vector<32x64xbf16>, vector<8x64xf32> -> vector<8x64xf32>
    %c0_12 = arith.constant 0 : index
    %c0_13 = arith.constant 0 : index
    %13 = vector.load %arg7[%c0_12, %c0_13] : memref<1x64xf32, #tpu.memory_space<vmem>>, vector<1x64xf32>
    %14 = vector.broadcast %13 : vector<1x64xf32> to vector<8x64xf32>
    %15 = arith.addf %12, %14 : vector<8x64xf32>
    %16 = vector.extract_strided_slice %15 {offsets = [0, 0], sizes = [8, 32], strides = [1, 1]} : vector<8x64xf32> to vector<8x32xf32>
    %17 = vector.extract_strided_slice %15 {offsets = [0, 32], sizes = [8, 32], strides = [1, 1]} : vector<8x64xf32> to vector<8x32xf32>
    %18 = vector.extract_strided_slice %9 {offsets = [0, 0], sizes = [8, 8], strides = [1, 1]} : vector<8x32xf32> to vector<8x8xf32>
    %19 = arith.truncf %18 : vector<8x8xf32> to vector<8x8xbf16>
    %20 = vector.extract_strided_slice %16 {offsets = [0, 0], sizes = [8, 8], strides = [1, 1]} : vector<8x32xf32> to vector<8x8xf32>
    %21 = arith.truncf %20 : vector<8x8xf32> to vector<8x8xbf16>
    %22 = vector.extract_strided_slice %17 {offsets = [0, 0], sizes = [8, 8], strides = [1, 1]} : vector<8x32xf32> to vector<8x8xf32>
    %23 = arith.truncf %22 : vector<8x8xf32> to vector<8x8xbf16>
    %cst_14 = arith.constant dense<0.000000e+00> : vector<8x8xf32>
    %24 = tpu.matmul %19, %21, %cst_14 {dimension_numbers = #tpu.dot_dimension_numbers<[1], [1], [0], [0], [0, 0, 1, 0], [], []>} : vector<8x8xbf16>, vector<8x8xbf16>, vector<8x8xf32> -> vector<8x8xf32>
    %cst_15 = arith.constant dense<0xFF800000> : vector<8xf32>
    %25 = vector.multi_reduction <maximumf>, %24, %cst_15 [1] : vector<8x8xf32> to vector<8xf32>
    %26 = vector.shape_cast %25 : vector<8xf32> to vector<8x1xf32>
    %27 = vector.broadcast %26 : vector<8x1xf32> to vector<8x8xf32>
    %28 = arith.subf %24, %27 : vector<8x8xf32>
    %29 = math.exp %28 : vector<8x8xf32>
    %cst_16 = arith.constant dense<0.000000e+00> : vector<8xf32>
    %30 = vector.multi_reduction <add>, %29, %cst_16 [1] : vector<8x8xf32> to vector<8xf32>
    %31 = vector.shape_cast %30 : vector<8xf32> to vector<8x1xf32>
    %32 = tpu.reciprocal %31 {approx = true} : vector<8x1xf32> -> vector<8x1xf32>
    %33 = vector.broadcast %32 : vector<8x1xf32> to vector<8x8xf32>
    %34 = arith.mulf %29, %33 : vector<8x8xf32>
    %35 = arith.truncf %34 : vector<8x8xf32> to vector<8x8xbf16>
    %cst_17 = arith.constant dense<0.000000e+00> : vector<8x8xf32>
    %36 = tpu.matmul %35, %23, %cst_17 {dimension_numbers = #tpu.dot_dimension_numbers<[1], [0], [0], [1], [0, 0, 1, 1], [], []>} : vector<8x8xbf16>, vector<8x8xbf16>, vector<8x8xf32> -> vector<8x8xf32>
    %37 = vector.extract_strided_slice %9 {offsets = [0, 8], sizes = [8, 8], strides = [1, 1]} : vector<8x32xf32> to vector<8x8xf32>
    %38 = arith.truncf %37 : vector<8x8xf32> to vector<8x8xbf16>
    %39 = vector.extract_strided_slice %16 {offsets = [0, 8], sizes = [8, 8], strides = [1, 1]} : vector<8x32xf32> to vector<8x8xf32>
    %40 = arith.truncf %39 : vector<8x8xf32> to vector<8x8xbf16>
    %41 = vector.extract_strided_slice %17 {offsets = [0, 8], sizes = [8, 8], strides = [1, 1]} : vector<8x32xf32> to vector<8x8xf32>
    %42 = arith.truncf %41 : vector<8x8xf32> to vector<8x8xbf16>
    %cst_18 = arith.constant dense<0.000000e+00> : vector<8x8xf32>
    %43 = tpu.matmul %38, %40, %cst_18 {dimension_numbers = #tpu.dot_dimension_numbers<[1], [1], [0], [0], [0, 0, 1, 0], [], []>} : vector<8x8xbf16>, vector<8x8xbf16>, vector<8x8xf32> -> vector<8x8xf32>
    %cst_19 = arith.constant dense<0xFF800000> : vector<8xf32>
    %44 = vector.multi_reduction <maximumf>, %43, %cst_19 [1] : vector<8x8xf32> to vector<8xf32>
    %45 = vector.shape_cast %44 : vector<8xf32> to vector<8x1xf32>
    %46 = vector.broadcast %45 : vector<8x1xf32> to vector<8x8xf32>
    %47 = arith.subf %43, %46 : vector<8x8xf32>
    %48 = math.exp %47 : vector<8x8xf32>
    %cst_20 = arith.constant dense<0.000000e+00> : vector<8xf32>
    %49 = vector.multi_reduction <add>, %48, %cst_20 [1] : vector<8x8xf32> to vector<8xf32>
    %50 = vector.shape_cast %49 : vector<8xf32> to vector<8x1xf32>
    %51 = tpu.reciprocal %50 {approx = true} : vector<8x1xf32> -> vector<8x1xf32>
    %52 = vector.broadcast %51 : vector<8x1xf32> to vector<8x8xf32>
    %53 = arith.mulf %48, %52 : vector<8x8xf32>
    %54 = arith.truncf %53 : vector<8x8xf32> to vector<8x8xbf16>
    %cst_21 = arith.constant dense<0.000000e+00> : vector<8x8xf32>
    %55 = tpu.matmul %54, %42, %cst_21 {dimension_numbers = #tpu.dot_dimension_numbers<[1], [0], [0], [1], [0, 0, 1, 1], [], []>} : vector<8x8xbf16>, vector<8x8xbf16>, vector<8x8xf32> -> vector<8x8xf32>
    %56 = vector.extract_strided_slice %9 {offsets = [0, 16], sizes = [8, 8], strides = [1, 1]} : vector<8x32xf32> to vector<8x8xf32>
    %57 = arith.truncf %56 : vector<8x8xf32> to vector<8x8xbf16>
    %58 = vector.extract_strided_slice %16 {offsets = [0, 16], sizes = [8, 8], strides = [1, 1]} : vector<8x32xf32> to vector<8x8xf32>
    %59 = arith.truncf %58 : vector<8x8xf32> to vector<8x8xbf16>
    %60 = vector.extract_strided_slice %17 {offsets = [0, 16], sizes = [8, 8], strides = [1, 1]} : vector<8x32xf32> to vector<8x8xf32>
    %61 = arith.truncf %60 : vector<8x8xf32> to vector<8x8xbf16>
    %cst_22 = arith.constant dense<0.000000e+00> : vector<8x8xf32>
    %62 = tpu.matmul %57, %59, %cst_22 {dimension_numbers = #tpu.dot_dimension_numbers<[1], [1], [0], [0], [0, 0, 1, 0], [], []>} : vector<8x8xbf16>, vector<8x8xbf16>, vector<8x8xf32> -> vector<8x8xf32>
    %cst_23 = arith.constant dense<0xFF800000> : vector<8xf32>
    %63 = vector.multi_reduction <maximumf>, %62, %cst_23 [1] : vector<8x8xf32> to vector<8xf32>
    %64 = vector.shape_cast %63 : vector<8xf32> to vector<8x1xf32>
    %65 = vector.broadcast %64 : vector<8x1xf32> to vector<8x8xf32>
    %66 = arith.subf %62, %65 : vector<8x8xf32>
    %67 = math.exp %66 : vector<8x8xf32>
    %cst_24 = arith.constant dense<0.000000e+00> : vector<8xf32>
    %68 = vector.multi_reduction <add>, %67, %cst_24 [1] : vector<8x8xf32> to vector<8xf32>
    %69 = vector.shape_cast %68 : vector<8xf32> to vector<8x1xf32>
    %70 = tpu.reciprocal %69 {approx = true} : vector<8x1xf32> -> vector<8x1xf32>
    %71 = vector.broadcast %70 : vector<8x1xf32> to vector<8x8xf32>
    %72 = arith.mulf %67, %71 : vector<8x8xf32>
    %73 = arith.truncf %72 : vector<8x8xf32> to vector<8x8xbf16>
    %cst_25 = arith.constant dense<0.000000e+00> : vector<8x8xf32>
    %74 = tpu.matmul %73, %61, %cst_25 {dimension_numbers = #tpu.dot_dimension_numbers<[1], [0], [0], [1], [0, 0, 1, 1], [], []>} : vector<8x8xbf16>, vector<8x8xbf16>, vector<8x8xf32> -> vector<8x8xf32>
    %75 = vector.extract_strided_slice %9 {offsets = [0, 24], sizes = [8, 8], strides = [1, 1]} : vector<8x32xf32> to vector<8x8xf32>
    %76 = arith.truncf %75 : vector<8x8xf32> to vector<8x8xbf16>
    %77 = vector.extract_strided_slice %16 {offsets = [0, 24], sizes = [8, 8], strides = [1, 1]} : vector<8x32xf32> to vector<8x8xf32>
    %78 = arith.truncf %77 : vector<8x8xf32> to vector<8x8xbf16>
    %79 = vector.extract_strided_slice %17 {offsets = [0, 24], sizes = [8, 8], strides = [1, 1]} : vector<8x32xf32> to vector<8x8xf32>
    %80 = arith.truncf %79 : vector<8x8xf32> to vector<8x8xbf16>
    %cst_26 = arith.constant dense<0.000000e+00> : vector<8x8xf32>
    %81 = tpu.matmul %76, %78, %cst_26 {dimension_numbers = #tpu.dot_dimension_numbers<[1], [1], [0], [0], [0, 0, 1, 0], [], []>} : vector<8x8xbf16>, vector<8x8xbf16>, vector<8x8xf32> -> vector<8x8xf32>
    %cst_27 = arith.constant dense<0xFF800000> : vector<8xf32>
    %82 = vector.multi_reduction <maximumf>, %81, %cst_27 [1] : vector<8x8xf32> to vector<8xf32>
    %83 = vector.shape_cast %82 : vector<8xf32> to vector<8x1xf32>
    %84 = vector.broadcast %83 : vector<8x1xf32> to vector<8x8xf32>
    %85 = arith.subf %81, %84 : vector<8x8xf32>
    %86 = math.exp %85 : vector<8x8xf32>
    %cst_28 = arith.constant dense<0.000000e+00> : vector<8xf32>
    %87 = vector.multi_reduction <add>, %86, %cst_28 [1] : vector<8x8xf32> to vector<8xf32>
    %88 = vector.shape_cast %87 : vector<8xf32> to vector<8x1xf32>
    %89 = tpu.reciprocal %88 {approx = true} : vector<8x1xf32> -> vector<8x1xf32>
    %90 = vector.broadcast %89 : vector<8x1xf32> to vector<8x8xf32>
    %91 = arith.mulf %86, %90 : vector<8x8xf32>
    %92 = arith.truncf %91 : vector<8x8xf32> to vector<8x8xbf16>
    %cst_29 = arith.constant dense<0.000000e+00> : vector<8x8xf32>
    %93 = tpu.matmul %92, %80, %cst_29 {dimension_numbers = #tpu.dot_dimension_numbers<[1], [0], [0], [1], [0, 0, 1, 1], [], []>} : vector<8x8xbf16>, vector<8x8xbf16>, vector<8x8xf32> -> vector<8x8xf32>
    %94 = tpu.concatenate %36, %55, %74, %93 in 1 : vector<8x8xf32>, vector<8x8xf32>, vector<8x8xf32>, vector<8x8xf32> -> vector<8x32xf32>
    %95 = arith.truncf %94 : vector<8x32xf32> to vector<8x32xbf16>
    %c0_30 = arith.constant 0 : index
    %c0_31 = arith.constant 0 : index
    %96 = vector.load %arg8[%c0_30, %c0_31] : memref<32x32xbf16, #tpu.memory_space<vmem>>, vector<32x32xbf16>
    %cst_32 = arith.constant dense<0.000000e+00> : vector<8x32xf32>
    %97 = tpu.matmul %95, %96, %cst_32 {dimension_numbers = #tpu.dot_dimension_numbers<[1], [0], [0], [1], [0, 0, 1, 1], [], []>} : vector<8x32xbf16>, vector<32x32xbf16>, vector<8x32xf32> -> vector<8x32xf32>
    %c0_33 = arith.constant 0 : index
    %c0_34 = arith.constant 0 : index
    %98 = vector.load %arg9[%c0_33, %c0_34] : memref<1x32xf32, #tpu.memory_space<vmem>>, vector<1x32xf32>
    %99 = vector.broadcast %98 : vector<1x32xf32> to vector<8x32xf32>
    %100 = arith.addf %97, %99 : vector<8x32xf32>
    %101 = arith.addf %100, %1 : vector<8x32xf32>
    %c0_35 = arith.constant 0 : index
    %c0_36 = arith.constant 0 : index
    %102 = vector.load %arg10[%c0_35, %c0_36] : memref<1x32xf32, #tpu.memory_space<vmem>>, vector<1x32xf32>
    %c0_37 = arith.constant 0 : index
    %c0_38 = arith.constant 0 : index
    %103 = vector.load %arg11[%c0_37, %c0_38] : memref<1x32xf32, #tpu.memory_space<vmem>>, vector<1x32xf32>
    %cst_39 = arith.constant dense<0.000000e+00> : vector<8xf32>
    %104 = vector.multi_reduction <add>, %101, %cst_39 [1] : vector<8x32xf32> to vector<8xf32>
    %105 = vector.shape_cast %104 : vector<8xf32> to vector<8x1xf32>
    %cst_40 = arith.constant 3.200000e+01 : f32
    %106 = vector.broadcast %cst_40 : f32 to vector<8x1xf32>
    %107 = arith.divf %105, %106 : vector<8x1xf32>
    %108 = vector.broadcast %107 : vector<8x1xf32> to vector<8x32xf32>
    %109 = arith.subf %101, %108 : vector<8x32xf32>
    %110 = arith.mulf %109, %109 : vector<8x32xf32>
    %cst_41 = arith.constant dense<0.000000e+00> : vector<8xf32>
    %111 = vector.multi_reduction <add>, %110, %cst_41 [1] : vector<8x32xf32> to vector<8xf32>
    %112 = vector.shape_cast %111 : vector<8xf32> to vector<8x1xf32>
    %cst_42 = arith.constant 3.200000e+01 : f32
    %113 = vector.broadcast %cst_42 : f32 to vector<8x1xf32>
    %114 = arith.divf %112, %113 : vector<8x1xf32>
    %cst_43 = arith.constant 9.99999974E-6 : f32
    %115 = vector.broadcast %cst_43 : f32 to vector<8x1xf32>
    %116 = arith.addf %114, %115 : vector<8x1xf32>
    %117 = math.rsqrt %116 : vector<8x1xf32>
    %118 = vector.broadcast %117 : vector<8x1xf32> to vector<8x32xf32>
    %119 = arith.mulf %109, %118 : vector<8x32xf32>
    %120 = vector.broadcast %102 : vector<1x32xf32> to vector<8x32xf32>
    %121 = arith.mulf %119, %120 : vector<8x32xf32>
    %122 = vector.broadcast %103 : vector<1x32xf32> to vector<8x32xf32>
    %123 = arith.addf %121, %122 : vector<8x32xf32>
    %c0_44 = arith.constant 0 : index
    %c0_45 = arith.constant 0 : index
    %c0_46 = arith.constant 0 : index
    %124 = vector.load %arg12[%c0_44, %c0_45, %c0_46] : memref<1x8x32xf32, #tpu.memory_space<vmem>>, vector<1x8x32xf32>
    %125 = vector.shape_cast %124 : vector<1x8x32xf32> to vector<8x32xf32>
    %126 = vector.shape_cast %123 : vector<8x32xf32> to vector<1x8x32xf32>
    tpu.vector_store %arg12[%c0_44, %c0_45, %c0_46], %126 {strides = array<i32>} : memref<1x8x32xf32, #tpu.memory_space<vmem>>, vector<1x8x32xf32>,
    return
  }
  func.func @transform_0(%arg0: i32, %arg1: i32) -> (i32, i32, i32) {
    %c0_i32 = arith.constant 0 : i32
    %c0_i32_0 = arith.constant 0 : i32
    return %arg0, %arg1, %c0_i32 : i32, i32, i32
  }
  func.func @transform_1(%arg0: i32, %arg1: i32) -> (i32, i32, i32) {
    %c0_i32 = arith.constant 0 : i32
    %c0_i32_0 = arith.constant 0 : i32
    %c0_i32_1 = arith.constant 0 : i32
    return %arg0, %c0_i32, %c0_i32_0 : i32, i32, i32
  }
  func.func @transform_2(%arg0: i32, %arg1: i32) -> (i32, i32) {
    %c0_i32 = arith.constant 0 : i32
    %c0_i32_0 = arith.constant 0 : i32
    %c0_i32_1 = arith.constant 0 : i32
    return %c0_i32, %c0_i32_0 : i32, i32
  }
  func.func @transform_3(%arg0: i32, %arg1: i32) -> (i32, i32) {
    %c0_i32 = arith.constant 0 : i32
    %c0_i32_0 = arith.constant 0 : i32
    %c0_i32_1 = arith.constant 0 : i32
    return %c0_i32, %c0_i32_0 : i32, i32
  }
  func.func @transform_4(%arg0: i32, %arg1: i32) -> (i32, i32) {
    %c0_i32 = arith.constant 0 : i32
    %c0_i32_0 = arith.constant 0 : i32
    %c0_i32_1 = arith.constant 0 : i32
    return %c0_i32, %c0_i32_0 : i32, i32
  }
  func.func @transform_5(%arg0: i32, %arg1: i32) -> (i32, i32) {
    %c0_i32 = arith.constant 0 : i32
    %c0_i32_0 = arith.constant 0 : i32
    %c0_i32_1 = arith.constant 0 : i32
    return %c0_i32, %c0_i32_0 : i32, i32
  }
  func.func @transform_6(%arg0: i32, %arg1: i32) -> (i32, i32) {
    %c0_i32 = arith.constant 0 : i32
    %c0_i32_0 = arith.constant 0 : i32
    %c0_i32_1 = arith.constant 0 : i32
    return %c0_i32, %c0_i32_0 : i32, i32
  }
  func.func @transform_7(%arg0: i32, %arg1: i32) -> (i32, i32) {
    %c0_i32 = arith.constant 0 : i32
    %c0_i32_0 = arith.constant 0 : i32
    %c0_i32_1 = arith.constant 0 : i32
    return %c0_i32, %c0_i32_0 : i32, i32
  }
  func.func @transform_8(%arg0: i32, %arg1: i32) -> (i32, i32) {
    %c0_i32 = arith.constant 0 : i32
    %c0_i32_0 = arith.constant 0 : i32
    %c0_i32_1 = arith.constant 0 : i32
    return %c0_i32, %c0_i32_0 : i32, i32
  }
  func.func @transform_9(%arg0: i32, %arg1: i32) -> (i32, i32) {
    %c0_i32 = arith.constant 0 : i32
    %c0_i32_0 = arith.constant 0 : i32
    %c0_i32_1 = arith.constant 0 : i32
    return %c0_i32, %c0_i32_0 : i32, i32
  }
  func.func @transform_10(%arg0: i32, %arg1: i32) -> (i32, i32, i32) {
    %c0_i32 = arith.constant 0 : i32
    %c0_i32_0 = arith.constant 0 : i32
    return %arg0, %arg1, %c0_i32 : i32, i32, i32
  }
}

module attributes {stable_mosaic.version = 11 : i64} {
  func.func @_ffn_block_kernel(%arg0: i32, %arg1: i32, %arg2: memref<8x32xf32, #tpu.memory_space<vmem>>, %arg3: memref<32x64xbf16, #tpu.memory_space<vmem>>, %arg4: memref<1x64xf32, #tpu.memory_space<vmem>>, %arg5: memref<64x32xbf16, #tpu.memory_space<vmem>>, %arg6: memref<1x32xf32, #tpu.memory_space<vmem>>, %arg7: memref<1x32xf32, #tpu.memory_space<vmem>>, %arg8: memref<1x32xf32, #tpu.memory_space<vmem>>, %arg9: memref<8x32xf32, #tpu.memory_space<vmem>>, %arg10: memref<8x32xf32, #tpu.memory_space<vmem>>) attributes {dimension_semantics = [#tpu.dimension_semantics<parallel>, #tpu.dimension_semantics<arbitrary>], iteration_bounds = array<i64: 2, 1>, scalar_prefetch = 0 : i64, scratch_operands = 1 : i64, tpu.core_type = #tpu.core_type<tc>, window_params = [{transform_indices = @transform_0, window_bounds = array<i64: 8, 32>}, {transform_indices = @transform_1, window_bounds = array<i64: 32, 64>}, {transform_indices = @transform_2, window_bounds = array<i64: 1, 64>}, {transform_indices = @transform_3, window_bounds = array<i64: 64, 32>}, {pipeline_mode = #tpu.pipeline_mode<synchronous>, transform_indices = @transform_4, window_bounds = array<i64: 1, 32>}, {pipeline_mode = #tpu.pipeline_mode<synchronous>, transform_indices = @transform_5, window_bounds = array<i64: 1, 32>}, {pipeline_mode = #tpu.pipeline_mode<synchronous>, transform_indices = @transform_6, window_bounds = array<i64: 1, 32>}, {transform_indices = @transform_7, window_bounds = array<i64: 8, 32>}]} {
    %c0_i32 = arith.constant 0 : i32
    %0 = arith.cmpi eq, %arg1, %c0_i32 : i32
    %1 = arith.extui %0 : i1 to i32
    %c0_i32_0 = arith.constant 0 : i32
    %2 = arith.cmpi ne, %1, %c0_i32_0 : i32
    scf.if %2 {
      %cst_16 = arith.constant 0.000000e+00 : f32
      %21 = vector.broadcast %cst_16 : f32 to vector<8x32xf32>
      %c0_17 = arith.constant 0 : index
      %c0_18 = arith.constant 0 : index
      %22 = vector.load %arg10[%c0_17, %c0_18] : memref<8x32xf32, #tpu.memory_space<vmem>>, vector<8x32xf32>
      tpu.vector_store %arg10[%c0_17, %c0_18], %21 {strides = array<i32>} : memref<8x32xf32, #tpu.memory_space<vmem>>, vector<8x32xf32>,
    } else {
    }
    %c0 = arith.constant 0 : index
    %c0_1 = arith.constant 0 : index
    %3 = vector.load %arg2[%c0, %c0_1] : memref<8x32xf32, #tpu.memory_space<vmem>>, vector<8x32xf32>
    %4 = arith.truncf %3 : vector<8x32xf32> to vector<8x32xbf16>
    %c0_2 = arith.constant 0 : index
    %c0_3 = arith.constant 0 : index
    %5 = vector.load %arg3[%c0_2, %c0_3] : memref<32x64xbf16, #tpu.memory_space<vmem>>, vector<32x64xbf16>
    %cst = arith.constant dense<0.000000e+00> : vector<8x64xf32>
    %6 = tpu.matmul %4, %5, %cst {dimension_numbers = #tpu.dot_dimension_numbers<[1], [0], [0], [1], [0, 0, 1, 1], [], []>} : vector<8x32xbf16>, vector<32x64xbf16>, vector<8x64xf32> -> vector<8x64xf32>
    %c0_4 = arith.constant 0 : index
    %c0_5 = arith.constant 0 : index
    %7 = vector.load %arg4[%c0_4, %c0_5] : memref<1x64xf32, #tpu.memory_space<vmem>>, vector<1x64xf32>
    %8 = vector.broadcast %7 : vector<1x64xf32> to vector<8x64xf32>
    %9 = arith.addf %6, %8 : vector<8x64xf32>
    %cst_6 = arith.constant 0.000000e+00 : f32
    %10 = vector.broadcast %cst_6 : f32 to vector<8x64xf32>
    %11 = arith.maximumf %9, %10 : vector<8x64xf32>
    %c0_7 = arith.constant 0 : index
    %c0_8 = arith.constant 0 : index
    %12 = vector.load %arg10[%c0_7, %c0_8] : memref<8x32xf32, #tpu.memory_space<vmem>>, vector<8x32xf32>
    %13 = arith.truncf %11 : vector<8x64xf32> to vector<8x64xbf16>
    %c0_9 = arith.constant 0 : index
    %c0_10 = arith.constant 0 : index
    %14 = vector.load %arg5[%c0_9, %c0_10] : memref<64x32xbf16, #tpu.memory_space<vmem>>, vector<64x32xbf16>
    %cst_11 = arith.constant dense<0.000000e+00> : vector<8x32xf32>
    %15 = tpu.matmul %13, %14, %cst_11 {dimension_numbers = #tpu.dot_dimension_numbers<[1], [0], [0], [1], [0, 0, 1, 1], [], []>} : vector<8x64xbf16>, vector<64x32xbf16>, vector<8x32xf32> -> vector<8x32xf32>
    %16 = arith.addf %12, %15 : vector<8x32xf32>
    %c0_12 = arith.constant 0 : index
    %c0_13 = arith.constant 0 : index
    %17 = vector.load %arg10[%c0_12, %c0_13] : memref<8x32xf32, #tpu.memory_space<vmem>>, vector<8x32xf32>
    tpu.vector_store %arg10[%c0_12, %c0_13], %16 {strides = array<i32>} : memref<8x32xf32, #tpu.memory_space<vmem>>, vector<8x32xf32>,
    %c0_i32_14 = arith.constant 0 : i32
    %18 = arith.cmpi eq, %arg1, %c0_i32_14 : i32
    %19 = arith.extui %18 : i1 to i32
    %c0_i32_15 = arith.constant 0 : i32
    %20 = arith.cmpi ne, %19, %c0_i32_15 : i32
    scf.if %20 {
      %c0_16 = arith.constant 0 : index
      %c0_17 = arith.constant 0 : index
      %21 = vector.load %arg10[%c0_16, %c0_17] : memref<8x32xf32, #tpu.memory_space<vmem>>, vector<8x32xf32>
      %c0_18 = arith.constant 0 : index
      %c0_19 = arith.constant 0 : index
      %22 = vector.load %arg6[%c0_18, %c0_19] : memref<1x32xf32, #tpu.memory_space<vmem>>, vector<1x32xf32>
      %23 = vector.broadcast %22 : vector<1x32xf32> to vector<8x32xf32>
      %24 = arith.addf %21, %23 : vector<8x32xf32>
      %25 = arith.addf %24, %3 : vector<8x32xf32>
      %c0_20 = arith.constant 0 : index
      %c0_21 = arith.constant 0 : index
      %26 = vector.load %arg7[%c0_20, %c0_21] : memref<1x32xf32, #tpu.memory_space<vmem>>, vector<1x32xf32>
      %c0_22 = arith.constant 0 : index
      %c0_23 = arith.constant 0 : index
      %27 = vector.load %arg8[%c0_22, %c0_23] : memref<1x32xf32, #tpu.memory_space<vmem>>, vector<1x32xf32>
      %cst_24 = arith.constant dense<0.000000e+00> : vector<8xf32>
      %28 = vector.multi_reduction <add>, %25, %cst_24 [1] : vector<8x32xf32> to vector<8xf32>
      %29 = vector.shape_cast %28 : vector<8xf32> to vector<8x1xf32>
      %cst_25 = arith.constant 3.200000e+01 : f32
      %30 = vector.broadcast %cst_25 : f32 to vector<8x1xf32>
      %31 = arith.divf %29, %30 : vector<8x1xf32>
      %32 = vector.broadcast %31 : vector<8x1xf32> to vector<8x32xf32>
      %33 = arith.subf %25, %32 : vector<8x32xf32>
      %34 = arith.mulf %33, %33 : vector<8x32xf32>
      %cst_26 = arith.constant dense<0.000000e+00> : vector<8xf32>
      %35 = vector.multi_reduction <add>, %34, %cst_26 [1] : vector<8x32xf32> to vector<8xf32>
      %36 = vector.shape_cast %35 : vector<8xf32> to vector<8x1xf32>
      %cst_27 = arith.constant 3.200000e+01 : f32
      %37 = vector.broadcast %cst_27 : f32 to vector<8x1xf32>
      %38 = arith.divf %36, %37 : vector<8x1xf32>
      %cst_28 = arith.constant 9.99999974E-6 : f32
      %39 = vector.broadcast %cst_28 : f32 to vector<8x1xf32>
      %40 = arith.addf %38, %39 : vector<8x1xf32>
      %41 = math.rsqrt %40 : vector<8x1xf32>
      %42 = vector.broadcast %41 : vector<8x1xf32> to vector<8x32xf32>
      %43 = arith.mulf %33, %42 : vector<8x32xf32>
      %44 = vector.broadcast %26 : vector<1x32xf32> to vector<8x32xf32>
      %45 = arith.mulf %43, %44 : vector<8x32xf32>
      %46 = vector.broadcast %27 : vector<1x32xf32> to vector<8x32xf32>
      %47 = arith.addf %45, %46 : vector<8x32xf32>
      %c0_29 = arith.constant 0 : index
      %c0_30 = arith.constant 0 : index
      %48 = vector.load %arg9[%c0_29, %c0_30] : memref<8x32xf32, #tpu.memory_space<vmem>>, vector<8x32xf32>
      tpu.vector_store %arg9[%c0_29, %c0_30], %47 {strides = array<i32>} : memref<8x32xf32, #tpu.memory_space<vmem>>, vector<8x32xf32>,
    } else {
    }
    return
  }
  func.func @transform_0(%arg0: i32, %arg1: i32) -> (i32, i32) {
    %c0_i32 = arith.constant 0 : i32
    %c0_i32_0 = arith.constant 0 : i32
    return %arg0, %c0_i32 : i32, i32
  }
  func.func @transform_1(%arg0: i32, %arg1: i32) -> (i32, i32) {
    %c0_i32 = arith.constant 0 : i32
    %c0_i32_0 = arith.constant 0 : i32
    return %c0_i32, %arg1 : i32, i32
  }
  func.func @transform_2(%arg0: i32, %arg1: i32) -> (i32, i32) {
    %c0_i32 = arith.constant 0 : i32
    %c0_i32_0 = arith.constant 0 : i32
    return %c0_i32, %arg1 : i32, i32
  }
  func.func @transform_3(%arg0: i32, %arg1: i32) -> (i32, i32) {
    %c0_i32 = arith.constant 0 : i32
    %c0_i32_0 = arith.constant 0 : i32
    return %arg1, %c0_i32 : i32, i32
  }
  func.func @transform_4(%arg0: i32, %arg1: i32) -> (i32, i32) {
    %c0_i32 = arith.constant 0 : i32
    %c0_i32_0 = arith.constant 0 : i32
    %c0_i32_1 = arith.constant 0 : i32
    return %c0_i32, %c0_i32_0 : i32, i32
  }
  func.func @transform_5(%arg0: i32, %arg1: i32) -> (i32, i32) {
    %c0_i32 = arith.constant 0 : i32
    %c0_i32_0 = arith.constant 0 : i32
    %c0_i32_1 = arith.constant 0 : i32
    return %c0_i32, %c0_i32_0 : i32, i32
  }
  func.func @transform_6(%arg0: i32, %arg1: i32) -> (i32, i32) {
    %c0_i32 = arith.constant 0 : i32
    %c0_i32_0 = arith.constant 0 : i32
    %c0_i32_1 = arith.constant 0 : i32
    return %c0_i32, %c0_i32_0 : i32, i32
  }
  func.func @transform_7(%arg0: i32, %arg1: i32) -> (i32, i32) {
    %c0_i32 = arith.constant 0 : i32
    %c0_i32_0 = arith.constant 0 : i32
    return %arg0, %c0_i32 : i32, i32
  }
}

</mosaic_0001>

<bundles_post_ra>
// kernel: _lambda_.3
= control target key start
LH: loop header
LB: loop body
LE: loop exit
PB: predicated region body
PF: predicated region fallthrough
CT: control target
= control target key end

     0   :  { %s1368_s27 = smov 0   ;;  %s1370_s28 = smov 0   ;;  %s1521_s0 = inlined_call_operand.vmem [shape: f32[2,8,32], index: 0, kind: input, shape index: {}]   ;;  %s1522_s1 = inlined_call_operand.vmem [shape: f32[8,8], index: 1, kind: input, shape index: {}]   ;;  %s1523_s2 = inlined_call_operand.vmem [shape: bf16[32,96], index: 2, kind: input, shape index: {}]   ;;  %s1524_s3 = inlined_call_operand.vmem [shape: f32[1,96], index: 3, kind: input, shape index: {}]   ;;  %s1525_s4 = inlined_call_operand.vmem [shape: bf16[32,32], index: 4, kind: input, shape index: {}]   ;;  %s1526_s5 = inlined_call_operand.vmem [shape: f32[1,32], index: 5, kind: input, shape index: {}]   ;;  %s1527_s6 = inlined_call_operand.vmem [shape: f32[1,32], index: 6, kind: input, shape index: {}]   ;;  %s1528_s7 = inlined_call_operand.vmem [shape: f32[1,32], index: 7, kind: input, shape index: {}]   ;;  %s1529_s8 = inlined_call_operand.vmem [shape: f32[2,8,32], index: 8, kind: output, shape index: {}]  }
   0x1   :  { %s1372_s29 = smov 0  }
   0x2 LB: > { %s30_s30 = sadd.s32 1, %s1305_s28  ;;  %p1108_p0 = scmp.ge.s32.totalorder %s1309_s29, 1  ;;  %s1309_s29 = sphi %s1372_s29, %s18_s29   ;;  %s1305_s28 = sphi %s1370_s28, %s1531_s28   ;;  %s1301_s27 = sphi %s1368_s27, %s1530_s27  }
   0x3   : > { %p32_p1 = scmp.ge.s32.totalorder %s30_s30, 2  ;;  %p284_p2 = scmp.lt.s32.totalorder %s1309_s29, 3 }
   0x5   : > { %s1533_s30 = smov (%p32_p1, %s30_s30), 0  ;;  %p285_p3 = pnand %p1108_p0, %p284_p2 }
   0x6   : > { %v1265_v0 = vld [vmem:[%s1523_s2] sm:$0xff] (!%p285_p3)   ;;  %s1311_s11 = smov (!%p285_p3), 96   ;;  %v1266_v1 = vld [vmem:[%s1523_s2 + $0x8] sm:$0xff] (!%p285_p3)   ;;  %v1312_v2 = vmov (!%p285_p3), 0.0   ;;  %p323_p4 = scmp.lt.s32.totalorder (!%p285_p3), %s1301_s27, 1  ;;  %vm1313_vm0 = vmmov (!%p285_p3), 0  }
   0x7   : > { %288 = sbr.rel (%p285_p3) target bundleno = 1912 (0x778), region = 52  ;;  %408 = vrot.lane.b32.xlu0 (!%p285_p3), %v1265_v0, %s1311_s11  ;;  %1157 = vmatprep.subr.bf16.mxu0 (!%p285_p3), %v1312_v2  ;;  %v1111_v3 = vld [vmem:[%s1524_s3] ss:$0 sm:$0xff] (!%p285_p3)  ;;  %vm364_vm1 = vcmask (!%p285_p3), 261120   ;;  %s1314_s20 = smov (!%p285_p3), 120   ;;  %vm460_vm2 = vcmask (!%p285_p3), 64512  }
   0x8   : > { %1165 = vmatprep.subr.bf16.mxu1 (!%p285_p3), %v1312_v2  ;;  %1158 = vmatpush3.bf16.msra.mxu0 (!%p285_p3), %v1265_v0  ;;  %s1315_s21 = smov (!%p285_p3), 112   ;;  %s1316_s22 = smov (!%p285_p3), 104   ;;  %v457_v31 = vld [vmem:[%s1522_s1] sm:$0xff] (!%p285_p3)  ;;  %vm525_vm3 = vcmask (!%p285_p3), 1043456   ;;  %vm913_vm4 = vcmask (!%p285_p3), 130048   ;;  %vm915_vm5 = vcmask (!%p285_p3), 195584  }
   0x9   : > { %1159 = vmatprep.subr.bf16.mxu0 (!%p285_p3), %v1312_v2  ;;  %1161 = vmatprep.mubr.msk.bf16.mxu0 (!%p285_p3), %vm1313_vm0, %v1312_v2  ;;  %s1317_s25 = smov (!%p285_p3), 88   ;;  %s1318_s26 = smov (!%p285_p3), 72  }
   0xa   : > { %1169 = vmatprep.mubr.msk.bf16.mxu1 (!%p285_p3), %vm1313_vm0, %v1312_v2  ;;  %414 = vrot.lane.b32.xlu1 (!%p285_p3), %v1111_v3, %s1311_s11  ;;  %s1319_s9 = smov (!%p285_p3), 80   ;;  %s1320_s10 = smov (!%p285_p3), 8  }
   0xb   : > { %410 = vrot.lane.b32.xlu0 (!%p285_p3), %v1266_v1, %s1311_s11  ;;  %s1321_s15 = smov (!%p285_p3), 16   ;;  %s1322_s17 = smov (!%p285_p3), 24  }
   0xc   : > { %1160 = vmatpush3.bf16.msra.mxu0 (!%p285_p3), %v1266_v1 }
   0xd   : > { %1173 = vmatprep.subr.bf16.mxu0 (!%p285_p3), %v1312_v2 }
   0xe   : > { %s1535_s27 = smov (!%p323_p4, %s1301_s27), 1 }
   0xf   : > { %s1109_s16 = sshll.u32 %s1535_s27, 3 }
  0x10   : > { %s326_s19 = scalar_lea.vmem %s1521_s0, %s1109_s16 }
  0x11   : > { %v1413_v4 = vld [vmem:[%s326_s19] sm:$0xff] }
  0x12   : > { %v345_v5 = vpack.c.bf16 %v1413_v4, %v1413_v4 }
  0x14   : > { %1162 = vmatmul.mubr.msk.bf16.vlgmr.msra.gmra.mrb[0].mxu0 %vm364_vm1, %v345_v5 }
  0x15   : > { %1175 = vmatprep.mubr.msk.bf16.mxu0 %vm1313_vm0, %v1312_v2 }
  0x79   : > { %v409_v6 = vpop.permute.xlu0 %408 }
  0x7a   : > { %1166 = vmatpush3.bf16.msra.mxu1 %v409_v6 }
  0x7b   : > { %1167 = vmatprep.subr.bf16.mxu1 %v1312_v2 }
  0x7c   : > { %v415_v14 = vpop.permute.xlu1 %414 }
  0x7d   : > { %v411_v7 = vpop.permute.xlu0 %410 }
  0x7e   : > { %1168 = vmatpush3.bf16.msra.mxu1 %v411_v7 }
  0x7f   : > { %1179 = vmatprep.subr.bf16.mxu1 %v1312_v2 }
  0x81   : > { %1170 = vmatmul.mubr.msk.bf16.vlgmr.msra.gmra.mrb[0].mxu1 %vm364_vm1, %v345_v5 }
  0x82   : > { %1181 = vmatprep.mubr.msk.bf16.mxu1 %vm1313_vm0, %v1312_v2 }
  0xe7   : > { %v402_v8 = vpop.f32.mrb[0].mxu0 }
  0xe8   : > { %v403_v9 = vadd.f32 %v1111_v3, %v402_v8  ;;  %v1163_v10 = vpop.f32.mrb[1].mxu0 }
  0xe9   : > { %v405_v11 = vpop.f32.mrb[2].mxu0 }
  0xea   : > { %v458_v12 = vpack.c.bf16 %v403_v9, %v403_v9  ;;  %v1164_v13 = vpop.f32.mrb[3].mxu0 }
  0xec   : > { %570 = vrot.lane.b32.xlu0 %v458_v12, %s1314_s20 }
  0xf0   : > { %680 = vrot.lane.b32.xlu0 %v458_v12, %s1315_s21 }
  0xf4   : > { %790 = vrot.lane.b32.xlu0 %v458_v12, %s1316_s22 }
 0x154   : > { %v451_v15 = vpop.f32.mrb[0].mxu1 }
 0x155   : > { %v452_v16 = vadd.f32 %v451_v15, %v415_v14  ;;  %v1171_v17 = vpop.f32.mrb[1].mxu1 }
 0x156   : > { %v454_v18 = vpop.f32.mrb[2].mxu1 }
 0x157   : > { %v1426_v19 = vpack.c.bf16 %v452_v16, %v452_v16  ;;  %v1172_v20 = vpop.f32.mrb[3].mxu1 }
 0x159   : > { %572 = vrot.lane.b32.xlu1 %v1426_v19, %s1314_s20  ;;  %v465_v21 = vsel %vm460_vm2, %v1426_v19, 0 }
 0x15a   : > { %1174 = vmatpush3.bf16.xpose.msra.mxu0 %v465_v21 }
 0x15b   : > { %1185 = vmatprep.subr.bf16.mxu0 %v1312_v2 }
 0x15d   : > { %682 = vrot.lane.b32.xlu1 %v1426_v19, %s1315_s21 }
 0x15e   : > { %v571_v25 = vpop.permute.xlu0 %570 }
 0x161   : > { %792 = vrot.lane.b32.xlu1 %v1426_v19, %s1316_s22  ;;  %1176 = vmatmul.mubr.msk.bf16.vlgmr.msra.gmra.mrb[4].mxu0 %vm460_vm2, %v458_v12 }
 0x162   : > { %1187 = vmatprep.mubr.msk.bf16.mxu0 %vm1313_vm0, %v1312_v2  ;;  %v681_v28 = vpop.permute.xlu0 %680 }
 0x166   : > { %v791_v30 = vpop.permute.xlu0 %790 }
 0x1cb   : > { %v573_v22 = vpop.permute.xlu1 %572 }
 0x1cc   : > { %v578_v23 = vsel %vm460_vm2, %v573_v22, 0 }
 0x1cd   : > { %1186 = vmatpush3.bf16.xpose.msra.mxu0 %v578_v23 }
 0x1ce   : > { %1197 = vmatprep.subr.bf16.mxu0 %v1312_v2 }
 0x1cf   : > { %v683_v24 = vpop.permute.xlu1 %682 }
 0x1d0   : > { %v688_v26 = vsel %vm460_vm2, %v683_v24, 0 }
 0x1d3   : > { %v793_v27 = vpop.permute.xlu1 %792 }
 0x1d4   : > { %1188 = vmatmul.mubr.msk.bf16.vlgmr.msra.gmra.mrb[8].mxu0 %vm460_vm2, %v571_v25  ;;  %v798_v29 = vsel %vm460_vm2, %v793_v27, 0 }
 0x1d5   : > { %1198 = vmatpush3.bf16.xpose.msra.mxu0 %v688_v26  ;;  %1199 = vmatprep.mubr.msk.bf16.mxu0 %vm1313_vm0, %v1312_v2 }
 0x1d6   : > { %1209 = vmatprep.subr.bf16.mxu0 %v1312_v2 }
 0x1dc   : > { %1200 = vmatmul.mubr.msk.bf16.vlgmr.msra.gmra.mrb[12].mxu0 %vm460_vm2, %v681_v28 }
 0x1dd   : > { %1210 = vmatpush3.bf16.xpose.msra.mxu0 %v798_v29  ;;  %1211 = vmatprep.mubr.msk.bf16.mxu0 %vm1313_vm0, %v1312_v2 }
 0x1de   : > { %1221 = vmatprep.subr.bf16.mxu0 %v1312_v2 }
 0x1e4   : > { %1212 = vmatmul.mubr.msk.bf16.vlgmr.msra.gmra.mrb[16].mxu0 %vm460_vm2, %v791_v30 }
 0x1e5   : > { %1225 = vmatprep.mubr.msk.bf16.mxu0 %vm1313_vm0, %v1312_v2 }
 0x234   : > { %v501_v32 = vpop.f32.mrb[4].mxu0 }
 0x235   : > { %v502_v33 = vadd.f32 %v501_v32, %v457_v31  ;;  %v1177_v34 = vpop.f32.mrb[5].mxu0 }
 0x236   : > { %v504_v35 = vpop.f32.mrb[6].mxu0 }
 0x237   : > { %v1178_v36 = vpop.f32.mrb[7].mxu0  ;;  %v507_v37 = vsel %vm460_vm2, %v502_v33, -inf }
 0x238   : > { %508 = vmax.xlane.f32.xlu1 %v507_v37 }
 0x2a7   : > { %v614_v38 = vpop.f32.mrb[8].mxu0 }
 0x2a8   : > { %v615_v39 = vadd.f32 %v614_v38, %v457_v31  ;;  %v1189_v40 = vpop.f32.mrb[9].mxu0 }
 0x2a9   : > { %v617_v41 = vpop.f32.mrb[10].mxu0 }
 0x2aa   : > { %v1190_v42 = vpop.f32.mrb[11].mxu0  ;;  %v620_v43 = vsel %vm460_vm2, %v615_v39, -inf }
 0x2ab   : > { %621 = vmax.xlane.f32.xlu0 %v620_v43 }
 0x2af   : > { %v724_v44 = vpop.f32.mrb[12].mxu0 }
 0x2b0   : > { %v725_v45 = vadd.f32 %v724_v44, %v457_v31  ;;  %v1201_v46 = vpop.f32.mrb[13].mxu0 }
 0x2b1   : > { %v727_v47 = vpop.f32.mrb[14].mxu0  ;;  %v1267_v46 = vld [vmem:[%s1525_s4] sm:$0xff]  }
 0x2b2   : > { %v1202_v48 = vpop.f32.mrb[15].mxu0  ;;  %v730_v49 = vsel %vm460_vm2, %v725_v45, -inf  ;;  %1222 = vmatpush3.bf16.msra.mxu0 %v1267_v46  ;;  %v1268_v47 = vld [vmem:[%s1525_s4 + $0x8] sm:$0xff]  }
 0x2b3   : > { %731 = vmax.xlane.f32.xlu0 %v730_v49  ;;  %1223 = vmatprep.subr.bf16.mxu0 %v1312_v2 }
 0x2b6   : > { %1224 = vmatpush3.bf16.msra.mxu0 %v1268_v47 }
 0x2b7   : > { %v834_v50 = vpop.f32.mrb[16].mxu0 }
 0x2b8   : > { %v835_v51 = vadd.f32 %v834_v50, %v457_v31  ;;  %v1213_v52 = vpop.f32.mrb[17].mxu0 }
 0x2b9   : > { %v837_v53 = vpop.f32.mrb[18].mxu0 }
 0x2ba   : > { %v1214_v54 = vpop.f32.mrb[19].mxu0  ;;  %v840_v55 = vsel %vm460_vm2, %v835_v51, -inf }
 0x2bb   : > { %841 = vmax.xlane.f32.xlu1 %v840_v55 }
 0x2c5   : > { %v509_v56 = vpop.xlane.xlu1 %508 }
 0x2c6   : > { %v510_v57 = vsub.f32 %v502_v33, %v509_v56 }
 0x2c8   : > { %v511_v58 = vmul.f32 1.442695, %v510_v57 }
 0x2ca   : > { %1269 = vpow2.f32 %v511_v58 }
 0x2d4   : > { %v1270_v59 = vpop.eup %1269 }
 0x2d5   : > { %v513_v60 = vsel %vm460_vm2, %v1270_v59, 0.0 }
 0x2d6   : > { %514 = vadd.xlane.f32.xlu0 %v513_v60 }
 0x338   : > { %v622_v61 = vpop.xlane.xlu0 %621 }
 0x339   : > { %v623_v62 = vsub.f32 %v615_v39, %v622_v61 }
 0x33b   : > { %v624_v63 = vmul.f32 1.442695, %v623_v62  ;;  %v1124_v62 = vld [vmem:[%s1526_s5] ss:$0 sm:$0xff] }
 0x33d   : > { %1271 = vpow2.f32 %v624_v63 }
 0x340   : > { %v732_v0 = vpop.xlane.xlu0 %731 }
 0x341   : > { %v733_v1 = vsub.f32 %v725_v45, %v732_v0 }
 0x343   : > { %v734_v3 = vmul.f32 1.442695, %v733_v1 }
 0x345   : > { %1273 = vpow2.f32 %v734_v3 }
 0x347   : > { %v1272_v5 = vpop.eup %1271 }
 0x348   : > { %v626_v6 = vsel %vm460_vm2, %v1272_v5, 0.0  ;;  %v842_v9 = vpop.xlane.xlu1 %841 }
 0x349   : > { %627 = vadd.xlane.f32.xlu1 %v626_v6  ;;  %v843_v10 = vsub.f32 %v835_v51, %v842_v9 }
 0x34b   : > { %v844_v11 = vmul.f32 1.442695, %v843_v10 }
 0x34d   : > { %1275 = vpow2.f32 %v844_v11 }
 0x34f   : > { %v1274_v7 = vpop.eup %1273 }
 0x350   : > { %v736_v8 = vsel %vm460_vm2, %v1274_v7, 0.0 }
 0x351   : > { %737 = vadd.xlane.f32.xlu0 %v736_v8 }
 0x357   : > { %v1276_v12 = vpop.eup %1275 }
 0x358   : > { %v846_v13 = vsel %vm460_vm2, %v1276_v12, 0.0 }
 0x35a   : > { %632 = vrot.lane.b32.xlu1 %v1426_v19, %s1317_s25 }
 0x363   : > { %v515_v14 = vpop.xlane.xlu0 %514 }
 0x364   : > { %1277 = vrcp.f32 %v515_v14 }
 0x367   : > { %520 = vrot.lane.b32.xlu0 %v1426_v19, %s1311_s11 }
 0x36b   : > { %852 = vrot.lane.b32.xlu0 %v1426_v19, %s1318_s26  ;;  %s337_s26 = scalar_lea.vmem %s1529_s8, %s1109_s16 }
 0x36e   : > { %v1278_v16 = vpop.eup %1277 }
 0x36f   : > { %v517_v18 = vmul.f32 %v1278_v16, %v1270_v59 }
 0x371   : > { %v518_v23 = vpack.c.bf16 %v517_v18, %v517_v18  ;;  %v1129_v18 = vld [vmem:[%s1528_s7] ss:$0 sm:$0xff] }
 0x37e   : > { %847 = vadd.xlane.f32.xlu1 %v846_v13 }
 0x38f   : > { %742 = vrot.lane.b32.xlu1 %v1426_v19, %s1319_s9 }
 0x3d6   : > { %v628_v15 = vpop.xlane.xlu1 %627 }
 0x3d7   : > { %1279 = vrcp.f32 %v628_v15 }
 0x3da   : > { %v633_v22 = vpop.permute.xlu1 %632 }
 0x3db   : > { %v638_v25 = vsel %vm525_vm3, %v633_v22, 0 }
 0x3de   : > { %v738_v17 = vpop.xlane.xlu0 %737 }
 0x3df   : > { %1281 = vrcp.f32 %v738_v17 }
 0x3e1   : > { %v1280_v24 = vpop.eup %1279 }
 0x3e2   : > { %v521_v20 = vpop.permute.xlu0 %520  ;;  %v630_v19 = vmul.f32 %v1280_v24, %v1272_v5 }
 0x3e3   : > { %v527_v21 = vsel %vm525_vm3, %v521_v20, 0 }
 0x3e4   : > { %1180 = vmatpush3.bf16.msra.mxu1 %v527_v21  ;;  %v631_v26 = vpack.c.bf16 %v630_v19, %v630_v19 }
 0x3e5   : > { %1191 = vmatprep.subr.bf16.mxu1 %v1312_v2 }
 0x3e6   : > { %v853_v32 = vpop.permute.xlu0 %852 }
 0x3e7   : > { %1182 = vmatmul.mubr.msk.bf16.vlgmr.msra.gmra.mrb[4].mxu1 %vm460_vm2, %v518_v23  ;;  %v858_v34 = vsel %vm525_vm3, %v853_v32, 0 }
 0x3e8   : > { %1192 = vmatpush3.bf16.msra.mxu1 %v638_v25  ;;  %1193 = vmatprep.mubr.msk.bf16.mxu1 %vm1313_vm0, %v1312_v2 }
 0x3e9   : > { %1203 = vmatprep.subr.bf16.mxu1 %v1312_v2  ;;  %v1282_v27 = vpop.eup %1281 }
 0x3ea   : > { %v740_v29 = vmul.f32 %v1282_v27, %v1274_v7 }
 0x3ec   : > { %v741_v33 = vpack.c.bf16 %v740_v29, %v740_v29 }
 0x3ef   : > { %1194 = vmatmul.mubr.msk.bf16.vlgmr.msra.gmra.mrb[8].mxu1 %vm460_vm2, %v631_v26 }
 0x3f0   : > { %1205 = vmatprep.mubr.msk.bf16.mxu1 %vm1313_vm0, %v1312_v2 }
 0x40b   : > { %v848_v28 = vpop.xlane.xlu1 %847 }
 0x40c   : > { %1283 = vrcp.f32 %v848_v28 }
 0x40f   : > { %v743_v30 = vpop.permute.xlu1 %742 }
 0x410   : > { %v748_v31 = vsel %vm525_vm3, %v743_v30, 0 }
 0x411   : > { %1204 = vmatpush3.bf16.msra.mxu1 %v748_v31 }
 0x412   : > { %1215 = vmatprep.subr.bf16.mxu1 %v1312_v2 }
 0x414   : > { %1206 = vmatmul.mubr.msk.bf16.vlgmr.msra.gmra.mrb[12].mxu1 %vm460_vm2, %v741_v33 }
 0x415   : > { %1216 = vmatpush3.bf16.msra.mxu1 %v858_v34  ;;  %1217 = vmatprep.mubr.msk.bf16.mxu1 %vm1313_vm0, %v1312_v2 }
 0x416   : > { %v1284_v35 = vpop.eup %1283 }
 0x417   : > { %v850_v36 = vmul.f32 %v1284_v35, %v1276_v12 }
 0x419   : > { %v851_v37 = vpack.c.bf16 %v850_v36, %v850_v36 }
 0x41c   : > { %1218 = vmatmul.mubr.msk.bf16.vlgmr.msra.gmra.mrb[16].mxu1 %vm460_vm2, %v851_v37 }
 0x4ba   : > { %v563_v38 = vpop.f32.mrb[4].mxu1 }
 0x4bb   : > { %v1183_v39 = vpop.f32.mrb[5].mxu1 }
 0x4bc   : > { %v566_v40 = vpop.f32.mrb[6].mxu1 }
 0x4bd   : > { %v1184_v41 = vpop.f32.mrb[7].mxu1 }
 0x4c2   : > { %v674_v42 = vpop.f32.mrb[8].mxu1 }
 0x4c3   : > { %901 = vrot.lane.b32.xlu1 %v674_v42, %s1320_s10  ;;  %v1195_v43 = vpop.f32.mrb[9].mxu1 }
 0x4c4   : > { %v677_v44 = vpop.f32.mrb[10].mxu1 }
 0x4c5   : > { %v1196_v45 = vpop.f32.mrb[11].mxu1 }
 0x4e7   : > { %v784_v48 = vpop.f32.mrb[12].mxu1 }
 0x4e8   : > { %905 = vrot.lane.b32.xlu0 %v784_v48, %s1321_s15  ;;  %v1207_v49 = vpop.f32.mrb[13].mxu1 }
 0x4e9   : > { %v787_v50 = vpop.f32.mrb[14].mxu1 }
 0x4ea   : > { %v1208_v51 = vpop.f32.mrb[15].mxu1 }
 0x4ef   : > { %v894_v52 = vpop.f32.mrb[16].mxu1 }
 0x4f0   : > { %909 = vrot.lane.b32.xlu1 %v894_v52, %s1322_s17  ;;  %v1219_v53 = vpop.f32.mrb[17].mxu1 }
 0x4f1   : > { %v897_v54 = vpop.f32.mrb[18].mxu1 }
 0x4f2   : > { %v1220_v55 = vpop.f32.mrb[19].mxu1 }
 0x535   : > { %v902_v56 = vpop.permute.xlu1 %901 }
 0x536   : > { %v912_v57 = vsel %vm460_vm2, %v563_v38, %v902_v56 }
 0x55a   : > { %v906_v2 = vpop.permute.xlu0 %905 }
 0x55b   : > { %v914_v58 = vsel %vm913_vm4, %v912_v57, %v906_v2 }
 0x562   : > { %v910_v59 = vpop.permute.xlu1 %909 }
 0x563   : > { %v916_v60 = vsel %vm915_vm5, %v914_v58, %v910_v59 }
 0x564   : > { %v917_v61 = vpack.c.bf16 %v916_v60, %v916_v60 }
 0x566   : > { %1226 = vmatmul.mubr.msk.bf16.vlgmr.msra.gmra.mrb[20].mxu0 %vm364_vm1, %v917_v61 }
 0x639   : > { %v978_v63 = vpop.f32.mrb[20].mxu0 }
 0x63a   : > { %v979_v0 = vadd.f32 %v1124_v62, %v978_v63  ;;  %v1227_v1 = vpop.f32.mrb[21].mxu0 }
 0x63b   : > { %v981_v3 = vpop.f32.mrb[22].mxu0 }
 0x63c   : > { %v1228_v5 = vpop.f32.mrb[23].mxu0  ;;  %v984_v6 = vadd.f32 %v979_v0, %v1413_v4  ;;  %v1128_v4 = vld [vmem:[%s1527_s6] ss:$0 sm:$0xff] }
 0x63e   : > { %v987_v7 = vsel %vm364_vm1, %v984_v6, 0.0 }
 0x63f   : > { %988 = vadd.xlane.f32.xlu0 %v987_v7 }
 0x6cc   : > { %v989_v8 = vpop.xlane.xlu0 %988 }
 0x6cd   : > { %v991_v9 = vmul.f32 0.03125, %v989_v8 }
 0x6cf   : > { %v992_v10 = vsub.f32 %v984_v6, %v991_v9 }
 0x6d1   : > { %v993_v11 = vmul.f32 %v992_v10, %v992_v10 }
 0x6d3   : > { %v994_v12 = vsel %vm364_vm1, %v993_v11, 0.0 }
 0x6d4   : > { %995 = vadd.xlane.f32.xlu1 %v994_v12 }
 0x761   : > { %v996_v13 = vpop.xlane.xlu1 %995 }
 0x762   : > { %v997_v14 = vmul.f32 0.03125, %v996_v13 }
 0x764   : > { %v998_v15 = vadd.f32 1e-05, %v997_v14 }
 0x766   : > { %1285 = vrsqrt.f32 %v998_v15 }
 0x770   : > { %v1286_v16 = vpop.eup %1285 }
 0x771   : > { %v1000_v17 = vmul.f32 %v1286_v16, %v992_v10 }
 0x773   : > { %v1007_v20 = vmul.f32 %v1128_v4, %v1000_v17 }
 0x775   : > { %v1014_v21 = vadd.f32 %v1129_v18, %v1007_v20 }
 0x777   : > { %1015 = vst.msk [vmem:[%s337_s26] sm:$0xff] %vm364_vm1, %v1014_v21 }
 0x778 PF: > { %s18_s29 = sadd.s32 1, %s1309_s29   ;;  %s1530_s27 = smov %s1305_s28 }
 0x779   : > { %p15_p5 = scmp.ge.s32.totalorder %s18_s29, 4   ;;  %s1531_s28 = smov %s1533_s30 }
 0x77b   :  { %17 = sbr.rel (!%p15_p5) target bundleno = 2 (0x2), region = 85 }

// kernel: _lambda_.4
= control target key start
LH: loop header
LB: loop body
LE: loop exit
PB: predicated region body
PF: predicated region fallthrough
CT: control target
= control target key end

     0   :  { %s1465_s13 = smov 0   ;;  %s1467_s14 = smov 0   ;;  %s1621_s0 = inlined_call_operand.vmem [shape: f32[2,8,32], index: 0, kind: input, shape index: {}]   ;;  %s1622_s1 = inlined_call_operand.vmem [shape: f32[2,8,32], index: 1, kind: input, shape index: {}]   ;;  %s1623_s2 = inlined_call_operand.vmem [shape: bf16[32,32], index: 2, kind: input, shape index: {}]   ;;  %s1624_s3 = inlined_call_operand.vmem [shape: f32[1,32], index: 3, kind: input, shape index: {}]   ;;  %s1625_s4 = inlined_call_operand.vmem [shape: bf16[32,64], index: 4, kind: input, shape index: {}]   ;;  %s1626_s5 = inlined_call_operand.vmem [shape: f32[1,64], index: 5, kind: input, shape index: {}]   ;;  %s1627_s6 = inlined_call_operand.vmem [shape: bf16[32,32], index: 6, kind: input, shape index: {}]   ;;  %s1628_s7 = inlined_call_operand.vmem [shape: f32[1,32], index: 7, kind: input, shape index: {}]   ;;  %s1629_s8 = inlined_call_operand.vmem [shape: f32[1,32], index: 8, kind: input, shape index: {}]   ;;  %s1630_s9 = inlined_call_operand.vmem [shape: f32[1,32], index: 9, kind: input, shape index: {}]   ;;  %s1631_s10 = inlined_call_operand.vmem [shape: f32[2,8,32], index: 10, kind: output, shape index: {}]  }
   0x1   :  { %s1469_s15 = smov 0  }
   0x2 LB: > { %s32_s16 = sadd.s32 1, %s1392_s14  ;;  %p1189_p0 = scmp.ge.s32.totalorder %s1396_s15, 1  ;;  %s1396_s15 = sphi %s1469_s15, %s20_s15   ;;  %s1392_s14 = sphi %s1467_s14, %s1633_s14   ;;  %s1388_s13 = sphi %s1465_s13, %s1632_s13  }
   0x3   : > { %p34_p1 = scmp.ge.s32.totalorder %s32_s16, 2  ;;  %p339_p2 = scmp.lt.s32.totalorder %s1396_s15, 3 }
   0x5   : > { %s1635_s16 = smov (%p34_p1, %s32_s16), 0  ;;  %p340_p3 = pnand %p1189_p0, %p339_p2 }
   0x6   : > { %v1350_v0 = vld [vmem:[%s1625_s4] sm:$0xff] (!%p340_p3)   ;;  %v1398_v1 = vmov (!%p340_p3), 0.0   ;;  %v1352_v3 = vld [vmem:[%s1625_s4 + $0x8] sm:$0xff] (!%p340_p3)   ;;  %vm1399_vm0 = vmmov (!%p340_p3), 0   ;;  %p385_p4 = scmp.lt.s32.totalorder (!%p340_p3), %s1388_s13, 1  ;;  %vm430_vm1 = vcmask (!%p340_p3), 261120  }
   0x7   : > { %343 = sbr.rel (%p340_p3) target bundleno = 1772 (0x6ec), region = 60  ;;  %1250 = vmatprep.subr.bf16.mxu1 (!%p340_p3), %v1398_v1  ;;  %1242 = vmatprep.subr.bf16.mxu0 (!%p340_p3), %v1398_v1  ;;  %v1351_v2 = vld [vmem:[%s1623_s2] sm:$0xff] (!%p340_p3)   ;;  %v1353_v4 = vld [vmem:[%s1623_s2 + $0x8] sm:$0xff] (!%p340_p3)   ;;  %vm543_vm2 = vcmask (!%p340_p3), 64512   ;;  %s1400_s19 = smov (!%p340_p3), 112   ;;  %vm608_vm3 = vcmask (!%p340_p3), 1043456  }
   0x8   : > { %1251 = vmatpush3.bf16.msra.mxu1 (!%p340_p3), %v1350_v0  ;;  %1254 = vmatprep.mubr.msk.bf16.mxu1 (!%p340_p3), %vm1399_vm0, %v1398_v1  ;;  %v1197_v9 = vld [vmem:[%s1626_s5] ss:$0 sm:$0xff] (!%p340_p3)  ;;  %s1401_s20 = smov (!%p340_p3), 120   ;;  %s1402_s21 = smov (!%p340_p3), 104   ;;  %vm996_vm4 = vcmask (!%p340_p3), 130048   ;;  %vm998_vm5 = vcmask (!%p340_p3), 195584  }
   0x9   : > { %1252 = vmatprep.subr.bf16.mxu1 (!%p340_p3), %v1398_v1  ;;  %1243 = vmatpush3.bf16.msra.mxu0 (!%p340_p3), %v1351_v2  ;;  %v1193_v10 = vld [vmem:[%s1624_s3] ss:$0 sm:$0xff] (!%p340_p3)  ;;  %s1403_s22 = smov (!%p340_p3), 96   ;;  %s1404_s23 = smov (!%p340_p3), 80  }
   0xa   : > { %1244 = vmatprep.subr.bf16.mxu0 (!%p340_p3), %v1398_v1  ;;  %1246 = vmatprep.mubr.msk.bf16.mxu0 (!%p340_p3), %vm1399_vm0, %v1398_v1  ;;  %s1405_s24 = smov (!%p340_p3), 72   ;;  %s1406_s26 = smov (!%p340_p3), 88  }
   0xb   : > { %s1407_s29 = smov (!%p340_p3), 8   ;;  %s1408_s12 = smov (!%p340_p3), 16  }
   0xc   : > { %1253 = vmatpush3.bf16.msra.mxu1 (!%p340_p3), %v1352_v3 }
   0xd   : > { %1245 = vmatpush3.bf16.msra.mxu0 (!%p340_p3), %v1353_v4  ;;  %1264 = vmatprep.subr.bf16.mxu1 (!%p340_p3), %v1398_v1 }
   0xe   : > { %s1637_s13 = smov (!%p385_p4, %s1388_s13), 1  ;;  %1258 = vmatprep.subr.bf16.mxu0 %v1398_v1 }
   0xf   : > { %s1503_s25 = sshll.u32 %s1637_s13, 3  ;;  %s1409_s13 = smov 24  }
  0x10   : > { %s395_s28 = scalar_lea.vmem %s1622_s1, %s1503_s25  ;;  %s391_s11 = scalar_lea.vmem %s1621_s0, %s1503_s25 }
  0x11   : > { %v405_v5 = vld [vmem:[%s395_s28] sm:$0xff] }
  0x12   : > { %v474_v6 = vpack.c.bf16 %v405_v5, %v405_v5  ;;  %v1515_v7 = vld [vmem:[%s391_s11] sm:$0xff] }
  0x13   : > { %v406_v8 = vpack.c.bf16 %v1515_v7, %v1515_v7 }
  0x14   : > { %1255 = vmatmul.mubr.msk.bf16.vlgmr.msra.gmra.mrb[0].mxu1 %vm430_vm1, %v474_v6 }
  0x15   : > { %1247 = vmatmul.mubr.msk.bf16.vlgmr.msra.gmra.mrb[0].mxu0 %vm430_vm1, %v406_v8  ;;  %1266 = vmatprep.mubr.msk.bf16.mxu1 %vm1399_vm0, %v1398_v1 }
  0x16   : > { %1260 = vmatprep.mubr.msk.bf16.mxu0 %vm1399_vm0, %v1398_v1 }
  0xe7   : > { %v535_v11 = vpop.f32.mrb[0].mxu1 }
  0xe8   : > { %v536_v12 = vadd.f32 %v1197_v9, %v535_v11  ;;  %v1256_v13 = vpop.f32.mrb[1].mxu1  ;;  %v468_v14 = vpop.f32.mrb[0].mxu0 }
  0xe9   : > { %v538_v15 = vpop.f32.mrb[2].mxu1  ;;  %v469_v16 = vadd.f32 %v1193_v10, %v468_v14  ;;  %v1248_v17 = vpop.f32.mrb[1].mxu0 }
  0xea   : > { %v1531_v18 = vpack.c.bf16 %v536_v12, %v536_v12  ;;  %v1257_v19 = vpop.f32.mrb[3].mxu1  ;;  %v471_v20 = vpop.f32.mrb[2].mxu0 }
  0xeb   : > { %v1249_v21 = vpop.f32.mrb[3].mxu0  ;;  %v541_v22 = vpack.c.bf16 %v469_v16, %v469_v16 }
  0xec   : > { %765 = vrot.lane.b32.xlu1 %v1531_v18, %s1400_s19  ;;  %655 = vrot.lane.b32.xlu0 %v1531_v18, %s1401_s20  ;;  %v548_v23 = vsel %vm543_vm2, %v1531_v18, 0 }
  0xed   : > { %1259 = vmatpush3.bf16.xpose.msra.mxu0 %v548_v23 }
  0xee   : > { %1270 = vmatprep.subr.bf16.mxu0 %v1398_v1 }
  0xf0   : > { %763 = vrot.lane.b32.xlu1 %v541_v22, %s1400_s19  ;;  %653 = vrot.lane.b32.xlu0 %v541_v22, %s1401_s20 }
  0xf4   : > { %873 = vrot.lane.b32.xlu1 %v541_v22, %s1402_s21  ;;  %875 = vrot.lane.b32.xlu0 %v1531_v18, %s1402_s21 }
  0xf5   : > { %1261 = vmatmul.mubr.msk.bf16.vlgmr.msra.gmra.mrb[4].mxu0 %vm543_vm2, %v541_v22 }
  0xf6   : > { %1272 = vmatprep.mubr.msk.bf16.mxu0 %vm1399_vm0, %v1398_v1 }
 0x15e   : > { %v656_v24 = vpop.permute.xlu0 %655  ;;  %v766_v26 = vpop.permute.xlu1 %765 }
 0x15f   : > { %v661_v25 = vsel %vm543_vm2, %v656_v24, 0  ;;  %v771_v28 = vsel %vm543_vm2, %v766_v26, 0 }
 0x160   : > { %1271 = vmatpush3.bf16.xpose.msra.mxu0 %v661_v25 }
 0x161   : > { %1282 = vmatprep.subr.bf16.mxu0 %v1398_v1 }
 0x162   : > { %v654_v27 = vpop.permute.xlu0 %653  ;;  %v764_v30 = vpop.permute.xlu1 %763 }
 0x166   : > { %v876_v29 = vpop.permute.xlu0 %875  ;;  %v874_v32 = vpop.permute.xlu1 %873 }
 0x167   : > { %1273 = vmatmul.mubr.msk.bf16.vlgmr.msra.gmra.mrb[8].mxu0 %vm543_vm2, %v654_v27  ;;  %v881_v31 = vsel %vm543_vm2, %v876_v29, 0 }
 0x168   : > { %1283 = vmatpush3.bf16.xpose.msra.mxu0 %v771_v28  ;;  %1284 = vmatprep.mubr.msk.bf16.mxu0 %vm1399_vm0, %v1398_v1 }
 0x169   : > { %1294 = vmatprep.subr.bf16.mxu0 %v1398_v1 }
 0x16f   : > { %1285 = vmatmul.mubr.msk.bf16.vlgmr.msra.gmra.mrb[12].mxu0 %vm543_vm2, %v764_v30 }
 0x170   : > { %1295 = vmatpush3.bf16.xpose.msra.mxu0 %v881_v31  ;;  %1296 = vmatprep.mubr.msk.bf16.mxu0 %vm1399_vm0, %v1398_v1 }
 0x171   : > { %1306 = vmatprep.subr.bf16.mxu0 %v1398_v1 }
 0x177   : > { %1297 = vmatmul.mubr.msk.bf16.vlgmr.msra.gmra.mrb[16].mxu0 %vm543_vm2, %v874_v32 }
 0x178   : > { %1310 = vmatprep.mubr.msk.bf16.mxu0 %vm1399_vm0, %v1398_v1 }
 0x1c8   : > { %v584_v33 = vpop.f32.mrb[4].mxu0 }
 0x1c9   : > { %v1262_v34 = vpop.f32.mrb[5].mxu0  ;;  %v590_v35 = vsel %vm543_vm2, %v584_v33, -inf }
 0x1ca   : > { %591 = vmax.xlane.f32.xlu0 %v590_v35  ;;  %v587_v36 = vpop.f32.mrb[6].mxu0 }
 0x1cb   : > { %v1263_v37 = vpop.f32.mrb[7].mxu0 }
 0x23a   : > { %v697_v38 = vpop.f32.mrb[8].mxu0 }
 0x23b   : > { %v1274_v39 = vpop.f32.mrb[9].mxu0  ;;  %v703_v40 = vsel %vm543_vm2, %v697_v38, -inf }
 0x23c   : > { %704 = vmax.xlane.f32.xlu1 %v703_v40  ;;  %v700_v41 = vpop.f32.mrb[10].mxu0  ;;  %v1354_v39 = vld [vmem:[%s1627_s6] sm:$0xff]  }
 0x23d   : > { %v1275_v42 = vpop.f32.mrb[11].mxu0  ;;  %1307 = vmatpush3.bf16.msra.mxu0 %v1354_v39 }
 0x23e   : > { %1308 = vmatprep.subr.bf16.mxu0 %v1398_v1 }
 0x242   : > { %v807_v43 = vpop.f32.mrb[12].mxu0 }
 0x243   : > { %v1286_v44 = vpop.f32.mrb[13].mxu0  ;;  %v813_v45 = vsel %vm543_vm2, %v807_v43, -inf }
 0x244   : > { %814 = vmax.xlane.f32.xlu0 %v813_v45  ;;  %v810_v46 = vpop.f32.mrb[14].mxu0  ;;  %v1355_v44 = vld [vmem:[%s1627_s6 + $0x8] sm:$0xff]  }
 0x245   : > { %v1287_v47 = vpop.f32.mrb[15].mxu0  ;;  %1309 = vmatpush3.bf16.msra.mxu0 %v1355_v44 }
 0x24a   : > { %v917_v48 = vpop.f32.mrb[16].mxu0 }
 0x24b   : > { %v1298_v49 = vpop.f32.mrb[17].mxu0  ;;  %v923_v50 = vsel %vm543_vm2, %v917_v48, -inf }
 0x24c   : > { %924 = vmax.xlane.f32.xlu0 %v923_v50  ;;  %v920_v51 = vpop.f32.mrb[18].mxu0 }
 0x24d   : > { %v1299_v52 = vpop.f32.mrb[19].mxu0 }
 0x257   : > { %v592_v53 = vpop.xlane.xlu0 %591 }
 0x258   : > { %v593_v54 = vsub.f32 %v584_v33, %v592_v53 }
 0x25a   : > { %v594_v55 = vmul.f32 1.442695, %v593_v54 }
 0x25c   : > { %1356 = vpow2.f32 %v594_v55 }
 0x266   : > { %v1357_v56 = vpop.eup %1356 }
 0x267   : > { %v596_v57 = vsel %vm543_vm2, %v1357_v56, 0.0 }
 0x268   : > { %597 = vadd.xlane.f32.xlu1 %v596_v57 }
 0x279   : > { %603 = vrot.lane.b32.xlu1 %v1531_v18, %s1403_s22 }
 0x2c9   : > { %v705_v58 = vpop.xlane.xlu1 %704 }
 0x2ca   : > { %v706_v59 = vsub.f32 %v697_v38, %v705_v58 }
 0x2cc   : > { %v707_v60 = vmul.f32 1.442695, %v706_v59  ;;  %v1209_v59 = vld [vmem:[%s1628_s7] ss:$0 sm:$0xff] }
 0x2ce   : > { %1358 = vpow2.f32 %v707_v60 }
 0x2d1   : > { %v815_v61 = vpop.xlane.xlu0 %814 }
 0x2d2   : > { %v816_v62 = vsub.f32 %v807_v43, %v815_v61 }
 0x2d4   : > { %v817_v63 = vmul.f32 1.442695, %v816_v62 }
 0x2d6   : > { %1360 = vpow2.f32 %v817_v63 }
 0x2d8   : > { %v1359_v0 = vpop.eup %1358 }
 0x2d9   : > { %v925_v2 = vpop.xlane.xlu0 %924  ;;  %v709_v3 = vsel %vm543_vm2, %v1359_v0, 0.0 }
 0x2da   : > { %v926_v4 = vsub.f32 %v917_v48, %v925_v2  ;;  %710 = vadd.xlane.f32.xlu0 %v709_v3 }
 0x2dc   : > { %v927_v5 = vmul.f32 1.442695, %v926_v4 }
 0x2de   : > { %1362 = vpow2.f32 %v927_v5 }
 0x2e0   : > { %v1361_v6 = vpop.eup %1360 }
 0x2e1   : > { %v819_v8 = vsel %vm543_vm2, %v1361_v6, 0.0 }
 0x2e2   : > { %820 = vadd.xlane.f32.xlu1 %v819_v8 }
 0x2e8   : > { %v1363_v9 = vpop.eup %1362 }
 0x2e9   : > { %v929_v10 = vsel %vm543_vm2, %v1363_v9, 0.0 }
 0x2ea   : > { %930 = vadd.xlane.f32.xlu0 %v929_v10 }
 0x2f3   : > { %825 = vrot.lane.b32.xlu1 %v1531_v18, %s1404_s23 }
 0x2f5   : > { %v598_v11 = vpop.xlane.xlu1 %597 }
 0x2f6   : > { %1364 = vrcp.f32 %v598_v11 }
 0x2f7   : > { %935 = vrot.lane.b32.xlu1 %v1531_v18, %s1405_s24 }
 0x2f9   : > { %v604_v12 = vpop.permute.xlu1 %603 }
 0x2fa   : > { %v610_v13 = vsel %vm608_vm3, %v604_v12, 0 }
 0x2fb   : > { %1265 = vmatpush3.bf16.msra.mxu1 %v610_v13 }
 0x2fc   : > { %1276 = vmatprep.subr.bf16.mxu1 %v1398_v1 }
 0x300   : > { %v1365_v14 = vpop.eup %1364  ;;  %715 = vrot.lane.b32.xlu0 %v1531_v18, %s1406_s26  ;;  %s402_s26 = scalar_lea.vmem %s1631_s10, %s1503_s25 }
 0x301   : > { %v600_v15 = vmul.f32 %v1365_v14, %v1357_v56 }
 0x303   : > { %v601_v16 = vpack.c.bf16 %v600_v15, %v600_v15  ;;  %v1214_v15 = vld [vmem:[%s1630_s9] ss:$0 sm:$0xff] }
 0x305   : > { %1267 = vmatmul.mubr.msk.bf16.vlgmr.msra.gmra.mrb[4].mxu1 %vm543_vm2, %v601_v16 }
 0x306   : > { %1278 = vmatprep.mubr.msk.bf16.mxu1 %vm1399_vm0, %v1398_v1 }
 0x367   : > { %v711_v17 = vpop.xlane.xlu0 %710 }
 0x368   : > { %1366 = vrcp.f32 %v711_v17 }
 0x36f   : > { %v821_v19 = vpop.xlane.xlu1 %820 }
 0x370   : > { %1368 = vrcp.f32 %v821_v19 }
 0x372   : > { %v1367_v20 = vpop.eup %1366 }
 0x373   : > { %v713_v22 = vmul.f32 %v1367_v20, %v1359_v0  ;;  %v826_v25 = vpop.permute.xlu1 %825 }
 0x374   : > { %v831_v27 = vsel %vm608_vm3, %v826_v25, 0 }
 0x375   : > { %v714_v18 = vpack.c.bf16 %v713_v22, %v713_v22 }
 0x377   : > { %v931_v21 = vpop.xlane.xlu0 %930  ;;  %v936_v29 = vpop.permute.xlu1 %935 }
 0x378   : > { %1370 = vrcp.f32 %v931_v21  ;;  %v941_v32 = vsel %vm608_vm3, %v936_v29, 0 }
 0x37a   : > { %v1369_v26 = vpop.eup %1368 }
 0x37b   : > { %v716_v23 = vpop.permute.xlu0 %715  ;;  %v823_v28 = vmul.f32 %v1369_v26, %v1361_v6 }
 0x37c   : > { %v721_v24 = vsel %vm608_vm3, %v716_v23, 0 }
 0x37d   : > { %1277 = vmatpush3.bf16.msra.mxu1 %v721_v24  ;;  %v824_v30 = vpack.c.bf16 %v823_v28, %v823_v28 }
 0x37e   : > { %1288 = vmatprep.subr.bf16.mxu1 %v1398_v1 }
 0x380   : > { %1279 = vmatmul.mubr.msk.bf16.vlgmr.msra.gmra.mrb[8].mxu1 %vm543_vm2, %v714_v18 }
 0x381   : > { %1289 = vmatpush3.bf16.msra.mxu1 %v831_v27  ;;  %1290 = vmatprep.mubr.msk.bf16.mxu1 %vm1399_vm0, %v1398_v1 }
 0x382   : > { %1300 = vmatprep.subr.bf16.mxu1 %v1398_v1  ;;  %v1371_v31 = vpop.eup %1370 }
 0x383   : > { %v933_v33 = vmul.f32 %v1371_v31, %v1363_v9 }
 0x385   : > { %v934_v34 = vpack.c.bf16 %v933_v33, %v933_v33 }
 0x388   : > { %1291 = vmatmul.mubr.msk.bf16.vlgmr.msra.gmra.mrb[12].mxu1 %vm543_vm2, %v824_v30 }
 0x389   : > { %1301 = vmatpush3.bf16.msra.mxu1 %v941_v32  ;;  %1302 = vmatprep.mubr.msk.bf16.mxu1 %vm1399_vm0, %v1398_v1 }
 0x390   : > { %1303 = vmatmul.mubr.msk.bf16.vlgmr.msra.gmra.mrb[16].mxu1 %vm543_vm2, %v934_v34 }
 0x3d8   : > { %v646_v35 = vpop.f32.mrb[4].mxu1 }
 0x3d9   : > { %v1268_v36 = vpop.f32.mrb[5].mxu1 }
 0x3da   : > { %v649_v37 = vpop.f32.mrb[6].mxu1 }
 0x3db   : > { %v1269_v38 = vpop.f32.mrb[7].mxu1 }
 0x453   : > { %v757_v40 = vpop.f32.mrb[8].mxu1 }
 0x454   : > { %984 = vrot.lane.b32.xlu0 %v757_v40, %s1407_s29  ;;  %v1280_v41 = vpop.f32.mrb[9].mxu1 }
 0x455   : > { %v760_v42 = vpop.f32.mrb[10].mxu1 }
 0x456   : > { %v1281_v43 = vpop.f32.mrb[11].mxu1 }
 0x45b   : > { %v867_v45 = vpop.f32.mrb[12].mxu1 }
 0x45c   : > { %988 = vrot.lane.b32.xlu1 %v867_v45, %s1408_s12  ;;  %v1292_v46 = vpop.f32.mrb[13].mxu1 }
 0x45d   : > { %v870_v47 = vpop.f32.mrb[14].mxu1 }
 0x45e   : > { %v1293_v48 = vpop.f32.mrb[15].mxu1 }
 0x463   : > { %v977_v49 = vpop.f32.mrb[16].mxu1 }
 0x464   : > { %992 = vrot.lane.b32.xlu0 %v977_v49, %s1409_s13  ;;  %v1304_v1 = vpop.f32.mrb[17].mxu1 }
 0x465   : > { %v980_v50 = vpop.f32.mrb[18].mxu1 }
 0x466   : > { %v1305_v51 = vpop.f32.mrb[19].mxu1 }
 0x4c6   : > { %v985_v52 = vpop.permute.xlu0 %984 }
 0x4c7   : > { %v995_v54 = vsel %vm543_vm2, %v646_v35, %v985_v52 }
 0x4ce   : > { %v989_v53 = vpop.permute.xlu1 %988 }
 0x4cf   : > { %v997_v55 = vsel %vm996_vm4, %v995_v54, %v989_v53 }
 0x4d6   : > { %v993_v56 = vpop.permute.xlu0 %992 }
 0x4d7   : > { %v999_v57 = vsel %vm998_vm5, %v997_v55, %v993_v56 }
 0x4d8   : > { %v1000_v58 = vpack.c.bf16 %v999_v57, %v999_v57 }
 0x4da   : > { %1311 = vmatmul.mubr.msk.bf16.vlgmr.msra.gmra.mrb[20].mxu0 %vm430_vm1, %v1000_v58 }
 0x5ad   : > { %v1061_v60 = vpop.f32.mrb[20].mxu0 }
 0x5ae   : > { %v1062_v61 = vadd.f32 %v1209_v59, %v1061_v60  ;;  %v1312_v62 = vpop.f32.mrb[21].mxu0 }
 0x5af   : > { %v1064_v63 = vpop.f32.mrb[22].mxu0 }
 0x5b0   : > { %v1313_v0 = vpop.f32.mrb[23].mxu0  ;;  %v1067_v2 = vadd.f32 %v1062_v61, %v1515_v7  ;;  %v1213_v7 = vld [vmem:[%s1629_s8] ss:$0 sm:$0xff] }
 0x5b2   : > { %v1070_v3 = vsel %vm430_vm1, %v1067_v2, 0.0 }
 0x5b3   : > { %1071 = vadd.xlane.f32.xlu1 %v1070_v3 }
 0x640   : > { %v1072_v4 = vpop.xlane.xlu1 %1071 }
 0x641   : > { %v1074_v5 = vmul.f32 0.03125, %v1072_v4 }
 0x643   : > { %v1075_v6 = vsub.f32 %v1067_v2, %v1074_v5 }
 0x645   : > { %v1076_v8 = vmul.f32 %v1075_v6, %v1075_v6 }
 0x647   : > { %v1077_v9 = vsel %vm430_vm1, %v1076_v8, 0.0 }
 0x648   : > { %1078 = vadd.xlane.f32.xlu0 %v1077_v9 }
 0x6d5   : > { %v1079_v10 = vpop.xlane.xlu0 %1078 }
 0x6d6   : > { %v1080_v11 = vmul.f32 0.03125, %v1079_v10 }
 0x6d8   : > { %v1081_v12 = vadd.f32 1e-05, %v1080_v11 }
 0x6da   : > { %1372 = vrsqrt.f32 %v1081_v12 }
 0x6e4   : > { %v1373_v13 = vpop.eup %1372 }
 0x6e5   : > { %v1083_v14 = vmul.f32 %v1373_v13, %v1075_v6 }
 0x6e7   : > { %v1090_v16 = vmul.f32 %v1213_v7, %v1083_v14 }
 0x6e9   : > { %v1097_v17 = vadd.f32 %v1214_v15, %v1090_v16 }
 0x6eb   : > { %1098 = vst.msk [vmem:[%s402_s26] sm:$0xff] %vm430_vm1, %v1097_v17 }
 0x6ec PF: > { %s20_s15 = sadd.s32 1, %s1396_s15   ;;  %s1632_s13 = smov %s1392_s14 }
 0x6ed   : > { %p17_p5 = scmp.ge.s32.totalorder %s20_s15, 4   ;;  %s1633_s14 = smov %s1635_s16 }
 0x6ef   :  { %19 = sbr.rel (!%p17_p5) target bundleno = 2 (0x2), region = 93 }

// kernel: _lambda_.5
= control target key start
LH: loop header
LB: loop body
LE: loop exit
PB: predicated region body
PF: predicated region fallthrough
CT: control target
= control target key end

     0   :  { %12 = vsyncpa [#allocation4], 0  ;;  %s1053_s0 = inlined_call_operand.vmem [shape: f32[16,32], index: 0, kind: input, shape index: {}]   ;;  %s1054_s1 = inlined_call_operand.vmem [shape: bf16[32,64], index: 1, kind: input, shape index: {}]   ;;  %s1055_s2 = inlined_call_operand.vmem [shape: f32[1,64], index: 2, kind: input, shape index: {}]   ;;  %s1056_s3 = inlined_call_operand.vmem [shape: bf16[64,32], index: 3, kind: input, shape index: {}]   ;;  %s1057_s4 = inlined_call_operand.vmem [shape: f32[1,32], index: 4, kind: input, shape index: {}]   ;;  %s1058_s5 = inlined_call_operand.vmem [shape: f32[1,32], index: 5, kind: input, shape index: {}]   ;;  %s1059_s6 = inlined_call_operand.vmem [shape: f32[1,32], index: 6, kind: input, shape index: {}]   ;;  %s1060_s7 = inlined_call_operand.hbm [shape: f32[16,32], index: 7, kind: output, shape index: {}]  }
   0x1   :  { %14 = vsyncpa [#allocation4 + $0x1], 0  ;;  %s905_s24 = smov 0   ;;  %s907_s25 = smov 0  }
   0x2   :  { %s909_s26 = smov 0   ;;  %s911_s27 = smov 0  }
   0x3   :  { %s913_s28 = smov 0   ;;  %s915_s29 = smov 0  }
   0x4 LB: > { %s663_s30 = sadd.s32 4294967295, %s860_s29   ;;  %s664_s8 = sadd.s32 4294967294, %s860_s29   ;;  %s860_s29 = sphi %s915_s29, %s20_s29   ;;  %s856_s28 = sphi %s913_s28, %s1067_s28   ;;  %s852_s27 = sphi %s911_s27, %s1066_s27   ;;  %s848_s26 = sphi %s909_s26, %s1065_s26   ;;  %s844_s25 = sphi %s907_s25, %s1064_s25   ;;  %s840_s24 = sphi %s905_s24, %s1063_s24  }
   0x5   : > { %s32_s9 = sadd.s32 1, %s856_s28  ;;  %s206_s10 = sadd.s32 1, %s848_s26 }
   0x6   : > { %p34_p0 = scmp.ge.s32.totalorder %s32_s9, 2  ;;  %p216_p1 = scmp.ne.s32.totalorder %s848_s26, %s844_s25 }
   0x7   : > { %p217_p2 = scmp.eq.s32.totalorder %s663_s30, 1  ;;  %p222_p3 = scmp.ne.s32.totalorder %s844_s25, %s840_s24 }
   0x8   : > { %s1069_s9 = smov (%p34_p0, %s32_s9), 0  ;;  %p223_p5 = scmp.eq.s32.totalorder %s664_s8, 1 }
   0x9   : > { %p945_p4 = por %p217_p2, %p216_p1  ;;  %s203_s12 = ssub.s32 %s856_s28, %s1069_s9 }
   0xa   : > { %p670_p6 = scmp.ge.s32.totalorder %s860_s29, 1  ;;  %p204_p7 = scmp.eq.s32.totalorder %s203_s12, 0 }
   0xb   : > { %p952_p8 = por %p223_p5, %p222_p3  ;;  %p279_p9 = scmp.lt.s32.totalorder %s860_s29, 3 }
   0xc   : > { %s958_s14 = scalar_select %p204_p7, %s848_s26, %s206_s10  }
   0xd   : > { %p280_p10 = pnand %p670_p6, %p279_p9 }
   0xe   : > { %v774_v0 = vld [vmem:[%s1054_s1] sm:$0xff] (!%p280_p10)   ;;  %v862_v1 = vmov (!%p280_p10), 0.0   ;;  %v775_v2 = vld [vmem:[%s1054_s1 + $0x8] sm:$0xff] (!%p280_p10)   ;;  %vm863_vm0 = vmmov (!%p280_p10), 0   ;;  %p322_p11 = scmp.lt.s32.totalorder (!%p280_p10), %s852_s27, 1  ;;  %vm344_vm1 = vcmask (!%p280_p10), 261120  }
   0xf   : > { %283 = sbr.rel (%p280_p10) target bundleno = 800 (0x320), region = 48  ;;  %697 = vmatprep.subr.bf16.mxu0 (!%p280_p10), %v862_v1  ;;  %705 = vmatprep.subr.bf16.mxu1 (!%p280_p10), %v862_v1  ;;  %345 = vst.msk [vmem:[#allocation2] sm:$0xff] (!%p280_p10), %vm344_vm1, %v862_v1  ;;  %v776_v3 = vld [vmem:[%s1056_s3] sm:$0xff] (!%p280_p10)   ;;  %v777_v4 = vld [vmem:[%s1056_s3 + $0x8] sm:$0xff] (!%p280_p10)   ;;  %v778_v7 = vld [vmem:[%s1056_s3 + $0x10] sm:$0xff] (!%p280_p10)   ;;  %vm450_vm2 = vcmask (!%p280_p10), 523264  }
  0x10   : > { %698 = vmatpush3.bf16.msra.mxu0 (!%p280_p10), %v774_v0  ;;  %701 = vmatprep.mubr.msk.bf16.mxu0 (!%p280_p10), %vm863_vm0, %v862_v1  ;;  %v779_v8 = vld [vmem:[%s1056_s3 + $0x18] sm:$0xff] (!%p280_p10)   ;;  %v673_v9 = vld [vmem:[%s1055_s2] ss:$0 sm:$0xff] (!%p280_p10)  ;;  %s319_s23 = sand.u32 (!%p280_p10), 1, %s844_s25   ;;  %s686_s16 = sshll.u32 (!%p280_p10), %s852_s27, 7 }
  0x11   : > { %699 = vmatprep.subr.bf16.mxu0 (!%p280_p10), %v862_v1  ;;  %713 = vmatprep.mubr.msk.bf16.mxu1 (!%p280_p10), %vm863_vm0, %v862_v1  ;;  %v682_v23 = vld [vmem:[%s1057_s4] ss:$0 sm:$0xff] (!%p280_p10)  ;;  %s541_s22 = scalar_lea.sflag (!%p280_p10), [#allocation4], %s319_s23 }
  0x12   : > { %706 = vmatpush3.bf16.msra.mxu1 (!%p280_p10), %v776_v3  ;;  %v683_v37 = vld [vmem:[%s1058_s5] ss:$0 sm:$0xff] (!%p280_p10) }
  0x13   : > { %707 = vmatprep.subr.bf16.mxu1 (!%p280_p10), %v862_v1  ;;  %v684_v39 = vld [vmem:[%s1059_s6] ss:$0 sm:$0xff] (!%p280_p10) }
  0x14   : > { %700 = vmatpush3.bf16.msra.mxu0 (!%p280_p10), %v775_v2 }
  0x16   : > { %s323_s21 = scalar_select %p322_p11, %s852_s27, 1  ;;  %708 = vmatpush3.bf16.msra.mxu1 %v777_v4  ;;  %v416_v17 = vld [vmem:[#allocation2] sm:$0xff] }
  0x17   : > { %709 = vmatprep.subr.bf16.mxu1 %v862_v1  ;;  %s864_s27 = smov [#allocation3]  }
  0x18   : > { %s672_s30 = sshll.u32 %s323_s21, 3  ;;  %s1005_s21 = scalar_lea.hbm %s1060_s7, %s686_s16 }
  0x19   : > { %s325_s12 = scalar_lea.vmem %s1053_s0, %s672_s30  ;;  %s671_s30 = sshll.u32 %s319_s23, 3 }
  0x1a   : > { %v346_v5 = vld [vmem:[%s325_s12] sm:$0xff]  ;;  %710 = vmatpush3.bf16.msra.mxu1 %v778_v7  ;;  %s321_s17 = scalar_lea.vmem [#allocation3], %s671_s30  ;;  %s786_s30 = sshll.u32 %s864_s27, 4  ;;  %s787_s30 = int_to_ptr.vmem [resolvable:$false] %s786_s30 }
  0x1b   : > { %v347_v6 = vpack.c.bf16 %v346_v5, %v346_v5  ;;  %711 = vmatprep.subr.bf16.mxu1 %v862_v1  ;;  %s554_s18 = sshll.u32 %s321_s17, 4  ;;  %s788_s10 = scalar_lea.vmem %s787_s30, 256  ;;  %s1007_s18 = int_to_ptr.vmem [resolvable:$true] %s554_s18 }
  0x1c   : > { %s782_s8 = scalar_lea.vmem %s1007_s18, 128  ;;  %p789_p1 = scmp.lt.s32.totalorder %s1007_s18, %s787_s30 }
  0x1d   : > { %702 = vmatmul.mubr.msk.bf16.vlgmr.msra.gmra.mrb[0].mxu0 %vm344_vm1, %v347_v6  ;;  %p783_p12 = scmp.ne.s32.totalorder %s1007_s18, %s782_s8  ;;  %p790_p2 = scmp.lt.s32.totalorder %s788_s10, %s782_s8 }
  0x1e   : > { %712 = vmatpush3.bf16.msra.mxu1 %v779_v8 }
  0x1f   : > { %p784_p13 = pnand %p783_p12, %p945_p4  ;;  %p791_p3 = por %p790_p2, %p789_p1 }
  0x21   : > { %p785_p0 = pneg %p784_p13 }
  0x23   : > { %p792_p5 = pnand %p791_p3, %p785_p0 }
  0xf0   : > { %v409_v10 = vpop.f32.mrb[0].mxu0 }
  0xf1   : > { %v410_v11 = vadd.f32 %v673_v9, %v409_v10  ;;  %v703_v12 = vpop.f32.mrb[1].mxu0 }
  0xf2   : > { %v412_v13 = vpop.f32.mrb[2].mxu0 }
  0xf3   : > { %v415_v14 = vmax.f32 %v410_v11, 0.0  ;;  %v704_v15 = vpop.f32.mrb[3].mxu0 }
  0xf5   : > { %v417_v16 = vpack.c.bf16 %v415_v14, %v415_v14 }
  0xf7   : > { %714 = vmatmul.mubr.msk.bf16.vlgmr.msra.gmra.mrb[0].mxu1 %vm450_vm2, %v417_v16 }
 0x1ca   : > { %v488_v18 = vpop.f32.mrb[0].mxu1 }
 0x1cb   : > { %v494_v19 = vadd.f32 %v488_v18, %v416_v17  ;;  %v715_v20 = vpop.f32.mrb[1].mxu1 }
 0x1cc   : > { %v491_v21 = vpop.f32.mrb[2].mxu1 }
 0x1cd   : > { %495 = vst.msk [vmem:[#allocation2] sm:$0xff] %vm344_vm1, %v494_v19  ;;  %v716_v22 = vpop.f32.mrb[3].mxu1 }
 0x1d4   : > { %v499_v24 = vld [vmem:[#allocation2] sm:$0xff] }
 0x1d5   : > { %v507_v25 = vadd.f32 %v682_v23, %v499_v24 }
 0x1d7   : > { %v508_v26 = vadd.f32 %v507_v25, %v346_v5 }
 0x1d9   : > { %v511_v27 = vsel %vm344_vm1, %v508_v26, 0.0 }
 0x1da   : > { %512 = vadd.xlane.f32.xlu0 %v511_v27 }
 0x267   : > { %v513_v28 = vpop.xlane.xlu0 %512 }
 0x268   : > { %v515_v29 = vmul.f32 0.03125, %v513_v28 }
 0x26a   : > { %v516_v30 = vsub.f32 %v508_v26, %v515_v29 }
 0x26c   : > { %v517_v31 = vmul.f32 %v516_v30, %v516_v30 }
 0x26e   : > { %v518_v32 = vsel %vm344_vm1, %v517_v31, 0.0 }
 0x26f   : > { %519 = vadd.xlane.f32.xlu0 %v518_v32 }
 0x2fc   : > { %v520_v33 = vpop.xlane.xlu0 %519 }
 0x2fd   : > { %v521_v34 = vmul.f32 0.03125, %v520_v33 }
 0x2ff   : > { %v522_v35 = vadd.f32 1e-05, %v521_v34 }
 0x301   : > { %780 = vrsqrt.f32 %v522_v35 }
 0x30b   : > { %v781_v36 = vpop.eup %780 }
 0x30c   : > { %v524_v38 = vmul.f32 %v781_v36, %v516_v30 }
 0x30e   : > { %v531_v40 = vmul.f32 %v683_v37, %v524_v38 }
 0x310   : > { %v538_v41 = vadd.f32 %v684_v39, %v531_v40 }
 0x312   : > { %539 = vst.msk [vmem:[%s321_s17] sm:$0xff] %vm344_vm1, %v538_v41 }
 0x313   : > { %795 = shalt.err (!%p792_p5)
}
 0x314   : > { %s796_s23 = scalar_lea.hbm %s1005_s21, 128  ;;  %s800_s16 = scalar_lea.hbm %s1060_s7, 256 }
 0x315   : > { %p797_p6 = scmp.ne.s32.totalorder %s1005_s21, %s796_s23  ;;  %p801_p10 = scmp.lt.u32.totalorder %s1005_s21, %s1060_s7 }
 0x316   : > { %p802_p11 = scmp.lt.u32.totalorder %s800_s16, %s796_s23  ;;  %p804_p13 = scmp.lt.u32.totalorder %s796_s23, %s1005_s21 }
 0x317   : > { %p798_p7 = pnand %p797_p6, %p945_p4 }
 0x318   : > { %p803_p12 = por %p802_p11, %p801_p10 }
 0x319   : > { %p799_p9 = pneg %p798_p7 }
 0x31a   : > { %p805_p0 = por %p804_p13, %p803_p12 }
 0x31c   : > { %p806_p1 = pnand %p805_p0, %p799_p9 }
 0x31e   : > { %809 = shalt.err (!%p806_p1)
}
 0x31f   : > { %717 = dma.vmem_to_hbm [thread:$0]  (%p945_p4), %s1007_s18, 128, %s1005_s21, %s541_s22  }
 0x320 PF: > { %p723_p2 = scmp.ge.s32.totalorder %s860_s29, 2  ;;  %s566_s20 = sand.u32 1, %s840_s24  }
 0x321   : > { %s567_s8 = scalar_lea.sflag [#allocation4], %s566_s20 }
 0x322   : > { %p720_p3 = pnand %p723_p2, %p952_p8 }
 0x324   : > { %835 = dma.done.wait (!%p720_p3), %s567_s8, 128  }
 0x325   : > { %837 = vsyncadd (!%p720_p3), %s567_s8, 4294967168  ;;  %s20_s29 = sadd.s32 1, %s860_s29   ;;  %s1063_s24 = smov %s844_s25 }
 0x326   : > { %p17_p5 = scmp.ge.s32.totalorder %s20_s29, 4   ;;  %s1064_s25 = smov %s848_s26 }
 0x327   : > { %s1065_s26 = smov %s958_s14  ;;  %s1066_s27 = smov %s856_s28 }
 0x328   : > { %s1067_s28 = smov %s1069_s9  ;;  %19 = sbr.rel (!%p17_p5) target bundleno = 4 (0x4), region = 100 }
 0x32f   :  { %572 = vsyncpa [#allocation4], 1 }
 0x330   :  { %574 = vsyncpa [#allocation4 + $0x1], 1 }

</bundles_post_ra>
